<compile_context>
chip_gen: v6e
topology: v6e:2x2x1
jax: 0.10.0
libtpu: 0.0.40
codegen_flags: <defaults>
</compile_context>

<pallas_src>
import functools

import jax
import jax.numpy as jnp
from jax import lax
from jax.experimental import pallas as pl
from jax.experimental.pallas import tpu as pltpu

# Module "parameters" (from soft_dice_cldice.__init__ defaults).
ITER = 3
ALPHA = 0.5
SMOOTH = 1.0


# ----------------------------- kernel-side math -----------------------------
def _roll_friendly(shape):
    """True when (sublane, lane) dims are (8, 128)-aligned -> use tpu rotate."""
    return shape[-2] % 8 == 0 and shape[-1] % 128 == 0


def _edge_masks(H, W):
    """Boundary masks for the four 1-step shifts; built once, reused by all."""
    row = lax.broadcasted_iota(jnp.int32, (H, W), 0)
    col = lax.broadcasted_iota(jnp.int32, (H, W), 1)
    return {
        (0, 1): row == H - 1,   # x[i+1] invalid on the last row
        (0, -1): row == 0,      # x[i-1] invalid on the first row
        (1, 1): col == W - 1,   # x[:, j+1] invalid on the last column
        (1, -1): col == 0,      # x[:, j-1] invalid on the first column
    }


def _shift(x, offset, axis, fill, masks):
    """result[i] = x[i + offset] along `axis`; out-of-bounds -> fill."""
    n = x.shape[axis]
    if masks is not None and _roll_friendly(x.shape):
        # Fast path: XLU rotate + one VPU select against a hoisted edge mask.
        rolled = pltpu.roll(x, (-offset) % n, axis)   # roll(x, s)[i] = x[i - s]
        return jnp.where(masks[(axis, offset)], fill, rolled)
    # Fallback for unaligned spatial shapes: slice + concatenate.
    k = abs(offset)
    pad_shape = list(x.shape)
    pad_shape[axis] = k
    pad = jnp.full(pad_shape, fill, dtype=x.dtype)
    if offset > 0:
        body = lax.slice_in_dim(x, k, n, axis=axis)
        return jnp.concatenate([body, pad], axis=axis)
    body = lax.slice_in_dim(x, 0, n - k, axis=axis)
    return jnp.concatenate([pad, body], axis=axis)


def _soft_erode(x, masks):
    # -maxpool(-x, (3,1), pad (1,0)) and -maxpool(-x, (1,3), pad (0,1)); min.
    inf = jnp.float32(jnp.inf)
    p1 = jnp.minimum(jnp.minimum(x, _shift(x, 1, 0, inf, masks)),
                     _shift(x, -1, 0, inf, masks))
    p2 = jnp.minimum(jnp.minimum(x, _shift(x, 1, 1, inf, masks)),
                     _shift(x, -1, 1, inf, masks))
    return jnp.minimum(p1, p2)


def _soft_dilate(x, masks):
    # maxpool(x, (3,3), pad (1,1)) -- separable: rows then columns.
    ninf = jnp.float32(-jnp.inf)
    v = jnp.maximum(jnp.maximum(x, _shift(x, 1, 0, ninf, masks)),
                    _shift(x, -1, 0, ninf, masks))
    return jnp.maximum(jnp.maximum(v, _shift(v, 1, 1, ninf, masks)),
                       _shift(v, -1, 1, ninf, masks))


def _soft_skel(img, iter_, masks):
    # Carries the eroded image: 1+iter erodes instead of 1+2*iter, with a
    # recurrence that is bit-identical to the reference soft_skel.
    e = _soft_erode(img, masks)
    skel = jnp.maximum(img - _soft_dilate(e, masks), 0.0)
    for _ in range(iter_):
        img = e
        e = _soft_erode(img, masks)
        delta = jnp.maximum(img - _soft_dilate(e, masks), 0.0)
        skel = skel + jnp.maximum(delta - skel * delta, 0.0)
    return skel


# --------------------------------- kernel -----------------------------------
def _cldice_kernel(logits_ref, labels_ref, out_ref, acc_ref, soft_ref, psum_ref,
                   *, iter_, alpha, smooth):
    b = pl.program_id(0)
    C, H, W = soft_ref.shape

    @pl.when(b == 0)
    def _init():
        for k in range(7):
            acc_ref[k] = jnp.float32(0.0)

    logits = logits_ref[0]            # (C, H, W) float32
    labels = labels_ref[0]            # (H, W)    int32

    # softmax over the channel axis (leading axis -> pure VPU/EUP elementwise);
    # one exact reciprocal per pixel + C multiplies instead of C divides.
    m = jnp.max(logits, axis=0, keepdims=True)
    e = jnp.exp(logits - m)
    denom = jnp.sum(e, axis=0, keepdims=True)
    soft = e * pl.reciprocal(denom)
    soft_ref[...] = soft

    # Per-batch sums that do not need the channel loop (channels 1: only).
    s_t = jnp.sum((labels != 0).astype(jnp.float32))
    s_p = jnp.sum(jnp.sum(soft[1:], axis=0))

    # Boundary masks for all morphological shifts: hoisted, loop-invariant.
    masks = _edge_masks(H, W)

    # Elementwise per-channel accumulation; reduced once per batch step.
    psum_ref[...] = jnp.zeros_like(psum_ref)

    @pl.loop(1, C)                     # channel 0 never contributes to any sum
    def _channel(c):
        p = soft_ref[c]                               # (H, W) softmax channel c
        t = (labels == c).astype(jnp.float32)         # one-hot channel c
        sp = _soft_skel(p, iter_, masks)
        st = _soft_skel(t, iter_, masks)
        psum_ref[0] = psum_ref[0] + t * p             # intersection
        psum_ref[1] = psum_ref[1] + sp * t
        psum_ref[2] = psum_ref[2] + sp
        psum_ref[3] = psum_ref[3] + st * p
        psum_ref[4] = psum_ref[4] + st

    acc_ref[0] = acc_ref[0] + jnp.sum(psum_ref[0])
    acc_ref[1] = acc_ref[1] + s_t
    acc_ref[2] = acc_ref[2] + s_p
    acc_ref[3] = acc_ref[3] + jnp.sum(psum_ref[1])
    acc_ref[4] = acc_ref[4] + jnp.sum(psum_ref[2])
    acc_ref[5] = acc_ref[5] + jnp.sum(psum_ref[3])
    acc_ref[6] = acc_ref[6] + jnp.sum(psum_ref[4])

    @pl.when(b == pl.num_programs(0) - 1)
    def _finalize():
        dice = 1.0 - (2.0 * acc_ref[0] + 1.0) / (acc_ref[1] + acc_ref[2] + 1.0)
        tprec = (acc_ref[3] + smooth) / (acc_ref[4] + smooth)
        tsens = (acc_ref[5] + smooth) / (acc_ref[6] + smooth)
        cl_dice = 1.0 - 2.0 * (tprec * tsens) / (tprec + tsens)
        out_ref[0] = (1.0 - alpha) * dice + alpha * cl_dice


def soft_dice_cldice_pallas(logits, labels, *, iter_=ITER, alpha=ALPHA, smooth=SMOOTH):
    """logits: (B, C, H, W) float32 raw scores; labels: (B, H, W) ints in [0, C)."""
    B, C, H, W = logits.shape
    kernel = functools.partial(_cldice_kernel, iter_=iter_, alpha=alpha, smooth=smooth)
    out = pl.pallas_call(
        kernel,
        out_shape=jax.ShapeDtypeStruct((1,), jnp.float32),
        grid_spec=pltpu.PrefetchScalarGridSpec(
            num_scalar_prefetch=0,
            grid=(B,),
            in_specs=[
                pl.BlockSpec((1, C, H, W), lambda b: (b, 0, 0, 0)),
                pl.BlockSpec((1, H, W), lambda b: (b, 0, 0)),
            ],
            out_specs=pl.BlockSpec(memory_space=pltpu.MemorySpace.SMEM),
            scratch_shapes=[
                pltpu.SMEM((7,), jnp.float32),       # cross-batch partial sums
                pltpu.VMEM((C, H, W), jnp.float32),  # softmax (dynamic channel index)
                pltpu.VMEM((5, H, W), jnp.float32),  # per-batch elementwise partials
            ],
        ),
        # Cross-step SMEM accumulation -> the batch axis must stay 'arbitrary'.
        compiler_params=pltpu.CompilerParams(dimension_semantics=("arbitrary",)),
    )(logits, labels.astype(jnp.int32))
    return out[0]


# ------------------------- independent JAX reference ------------------------
def _ref_shift(x, offset, axis, fill):
    y = jnp.roll(x, -offset, axis=axis)
    idx = lax.broadcasted_iota(jnp.int32, x.shape, axis)
    valid = (idx + offset >= 0) & (idx + offset < x.shape[axis])
    return jnp.where(valid, y, fill).astype(x.dtype)


def _ref_erode(x):
    inf = jnp.inf
    p1 = jnp.minimum(jnp.minimum(x, _ref_shift(x, 1, 2, inf)), _ref_shift(x, -1, 2, inf))
    p2 = jnp.minimum(jnp.minimum(x, _ref_shift(x, 1, 3, inf)), _ref_shift(x, -1, 3, inf))
    return jnp.minimum(p1, p2)


def _ref_dilate(x):
    ninf = -jnp.inf
    v = jnp.maximum(jnp.maximum(x, _ref_shift(x, 1, 2, ninf)), _ref_shift(x, -1, 2, ninf))
    return jnp.maximum(jnp.maximum(v, _ref_shift(v, 1, 3, ninf)), _ref_shift(v, -1, 3, ninf))


def _ref_skel(img, it):
    img1 = _ref_dilate(_ref_erode(img))
    skel = jax.nn.relu(img - img1)
    for _ in range(it):
        img = _ref_erode(img)
        img1 = _ref_dilate(_ref_erode(img))
        delta = jax.nn.relu(img - img1)
        skel = skel + jax.nn.relu(delta - skel * delta)
    return skel


def soft_dice_cldice_ref(logits, labels, iter_=ITER, alpha=ALPHA, smooth=SMOOTH):
    y_pred = jax.nn.softmax(logits, axis=1)
    y_true = jnp.transpose(jax.nn.one_hot(labels, logits.shape[1], dtype=jnp.float32),
                           (0, 3, 1, 2))
    inter = jnp.sum((y_true * y_pred)[:, 1:])
    dice = 1.0 - (2.0 * inter + 1.0) / (jnp.sum(y_true[:, 1:]) + jnp.sum(y_pred[:, 1:]) + 1.0)
    skel_pred = _ref_skel(y_pred, iter_)
    skel_true = _ref_skel(y_true, iter_)
    tprec = (jnp.sum((skel_pred * y_true)[:, 1:]) + smooth) / (jnp.sum(skel_pred[:, 1:]) + smooth)
    tsens = (jnp.sum((skel_true * y_pred)[:, 1:]) + smooth) / (jnp.sum(skel_true[:, 1:]) + smooth)
    cl_dice = 1.0 - 2.0 * (tprec * tsens) / (tprec + tsens)
    return (1.0 - alpha) * dice + alpha * cl_dice


# ----------------------------------- main ------------------------------------
if __name__ == "__main__":
    # W = 128 keeps the spatial plane lane-dense (full 128-lane vregs) and lets
    # the shifts use the fast pltpu.roll path; shapes stay small.
    B, C, H, W = 2, 4, 16, 128
    key = jax.random.PRNGKey(0)
    k1, k2 = jax.random.split(key)
    logits = jax.random.normal(k1, (B, C, H, W), dtype=jnp.float32)    # y_pred (raw scores)
    labels = jax.random.randint(k2, (B, H, W), 0, C, dtype=jnp.int32)  # y_true (class ids)

    loss = jax.block_until_ready(soft_dice_cldice_pallas(logits, labels))
    loss_ref = jax.block_until_ready(soft_dice_cldice_ref(logits, labels))
    assert jnp.allclose(loss, loss_ref, rtol=1e-4, atol=1e-4), (loss, loss_ref)

    print("KERNEL_OK")
</pallas_src>

<mosaic_0001>
module attributes {stable_mosaic.version = 11 : i64} {
  func.func @_cldice_kernel(%arg0: i32, %arg1: memref<1x4x16x128xf32, #tpu.memory_space<vmem>>, %arg2: memref<1x16x128xi32, #tpu.memory_space<vmem>>, %arg3: memref<1xf32, #tpu.memory_space<smem>>, %arg4: memref<7xf32, #tpu.memory_space<smem>>, %arg5: memref<4x16x128xf32, #tpu.memory_space<vmem>>, %arg6: memref<5x16x128xf32, #tpu.memory_space<vmem>>) attributes {dimension_semantics = [#tpu.dimension_semantics<arbitrary>], iteration_bounds = array<i64: 2>, scalar_prefetch = 0 : i64, scratch_operands = 3 : i64, tpu.core_type = #tpu.core_type<tc>, window_params = [{transform_indices = @transform_0, window_bounds = array<i64: 1, 4, 16, 128>}, {transform_indices = @transform_1, window_bounds = array<i64: 1, 16, 128>}, {transform_indices = @transform_2, window_bounds = array<i64: 1>}]} {
    %c0_i32 = arith.constant 0 : i32
    %0 = arith.cmpi eq, %arg0, %c0_i32 : i32
    %1 = arith.extui %0 : i1 to i32
    %c0_i32_0 = arith.constant 0 : i32
    %2 = arith.cmpi ne, %1, %c0_i32_0 : i32
    scf.if %2 {
      %cst_53 = arith.constant 0.000000e+00 : f32
      %c0_54 = arith.constant 0 : index
      %99 = memref.load %arg4[%c0_54] : memref<7xf32, #tpu.memory_space<smem>>
      memref.store %cst_53, %arg4[%c0_54] : memref<7xf32, #tpu.memory_space<smem>>
      %cst_55 = arith.constant 0.000000e+00 : f32
      %c1_56 = arith.constant 1 : index
      %100 = memref.load %arg4[%c1_56] : memref<7xf32, #tpu.memory_space<smem>>
      memref.store %cst_55, %arg4[%c1_56] : memref<7xf32, #tpu.memory_space<smem>>
      %cst_57 = arith.constant 0.000000e+00 : f32
      %c2_58 = arith.constant 2 : index
      %101 = memref.load %arg4[%c2_58] : memref<7xf32, #tpu.memory_space<smem>>
      memref.store %cst_57, %arg4[%c2_58] : memref<7xf32, #tpu.memory_space<smem>>
      %cst_59 = arith.constant 0.000000e+00 : f32
      %c3_60 = arith.constant 3 : index
      %102 = memref.load %arg4[%c3_60] : memref<7xf32, #tpu.memory_space<smem>>
      memref.store %cst_59, %arg4[%c3_60] : memref<7xf32, #tpu.memory_space<smem>>
      %cst_61 = arith.constant 0.000000e+00 : f32
      %c4_62 = arith.constant 4 : index
      %103 = memref.load %arg4[%c4_62] : memref<7xf32, #tpu.memory_space<smem>>
      memref.store %cst_61, %arg4[%c4_62] : memref<7xf32, #tpu.memory_space<smem>>
      %cst_63 = arith.constant 0.000000e+00 : f32
      %c5_64 = arith.constant 5 : index
      %104 = memref.load %arg4[%c5_64] : memref<7xf32, #tpu.memory_space<smem>>
      memref.store %cst_63, %arg4[%c5_64] : memref<7xf32, #tpu.memory_space<smem>>
      %cst_65 = arith.constant 0.000000e+00 : f32
      %c6_66 = arith.constant 6 : index
      %105 = memref.load %arg4[%c6_66] : memref<7xf32, #tpu.memory_space<smem>>
      memref.store %cst_65, %arg4[%c6_66] : memref<7xf32, #tpu.memory_space<smem>>
    } else {
    }
    %c0 = arith.constant 0 : index
    %c0_1 = arith.constant 0 : index
    %c0_2 = arith.constant 0 : index
    %c0_3 = arith.constant 0 : index
    %3 = vector.load %arg1[%c0, %c0_1, %c0_2, %c0_3] : memref<1x4x16x128xf32, #tpu.memory_space<vmem>>, vector<1x4x16x128xf32>
    %4 = vector.shape_cast %3 : vector<1x4x16x128xf32> to vector<4x16x128xf32>
    %c0_4 = arith.constant 0 : index
    %c0_5 = arith.constant 0 : index
    %c0_6 = arith.constant 0 : index
    %5 = vector.load %arg2[%c0_4, %c0_5, %c0_6] : memref<1x16x128xi32, #tpu.memory_space<vmem>>, vector<1x16x128xi32>
    %6 = vector.shape_cast %5 : vector<1x16x128xi32> to vector<16x128xi32>
    %cst = arith.constant dense<0xFF800000> : vector<16x128xf32>
    %7 = vector.multi_reduction <maximumf>, %4, %cst [0] : vector<4x16x128xf32> to vector<16x128xf32>
    %8 = vector.shape_cast %7 : vector<16x128xf32> to vector<1x16x128xf32>
    %9 = vector.broadcast %8 : vector<1x16x128xf32> to vector<4x16x128xf32>
    %10 = arith.subf %4, %9 : vector<4x16x128xf32>
    %11 = math.exp %10 : vector<4x16x128xf32>
    %cst_7 = arith.constant dense<0.000000e+00> : vector<16x128xf32>
    %12 = vector.multi_reduction <add>, %11, %cst_7 [0] : vector<4x16x128xf32> to vector<16x128xf32>
    %13 = vector.shape_cast %12 : vector<16x128xf32> to vector<1x16x128xf32>
    %14 = tpu.reciprocal %13 : vector<1x16x128xf32> -> vector<1x16x128xf32>
    %15 = vector.broadcast %14 : vector<1x16x128xf32> to vector<4x16x128xf32>
    %16 = arith.mulf %11, %15 : vector<4x16x128xf32>
    %c0_8 = arith.constant 0 : index
    %c0_9 = arith.constant 0 : index
    %c0_10 = arith.constant 0 : index
    %17 = vector.load %arg5[%c0_8, %c0_9, %c0_10] : memref<4x16x128xf32, #tpu.memory_space<vmem>>, vector<4x16x128xf32>
    tpu.vector_store %arg5[%c0_8, %c0_9, %c0_10], %16 {strides = array<i32>} : memref<4x16x128xf32, #tpu.memory_space<vmem>>, vector<4x16x128xf32>,
    %c0_i32_11 = arith.constant 0 : i32
    %18 = vector.broadcast %c0_i32_11 : i32 to vector<16x128xi32>
    %19 = arith.cmpi ne, %6, %18 : vector<16x128xi32>
    %20 = arith.extui %19 : vector<16x128xi1> to vector<16x128xi32>
    %21 = arith.sitofp %20 : vector<16x128xi32> to vector<16x128xf32>
    %22 = vector.shape_cast %21 : vector<16x128xf32> to vector<1x16x128xf32>
    %cst_12 = arith.constant dense<0.000000e+00> : vector<1xf32>
    %23 = vector.multi_reduction <add>, %22, %cst_12 [1, 2] : vector<1x16x128xf32> to vector<1xf32>
    %24 = vector.shape_cast %23 : vector<1xf32> to vector<1x1x1xf32>
    %25 = vector.extract %24[0, 0, 0] : f32 from vector<1x1x1xf32>
    %26 = vector.extract_strided_slice %16 {offsets = [1, 0, 0], sizes = [3, 16, 128], strides = [1, 1, 1]} : vector<4x16x128xf32> to vector<3x16x128xf32>
    %cst_13 = arith.constant dense<0.000000e+00> : vector<16x128xf32>
    %27 = vector.multi_reduction <add>, %26, %cst_13 [0] : vector<3x16x128xf32> to vector<16x128xf32>
    %28 = vector.shape_cast %27 : vector<16x128xf32> to vector<1x16x128xf32>
    %cst_14 = arith.constant dense<0.000000e+00> : vector<1xf32>
    %29 = vector.multi_reduction <add>, %28, %cst_14 [1, 2] : vector<1x16x128xf32> to vector<1xf32>
    %30 = vector.shape_cast %29 : vector<1xf32> to vector<1x1x1xf32>
    %31 = vector.extract %30[0, 0, 0] : f32 from vector<1x1x1xf32>
    %32 = tpu.iota {dimensions = array<i32: 0>} : vector<16x128xi32>
    %33 = tpu.iota {dimensions = array<i32: 1>} : vector<16x128xi32>
    %c15_i32 = arith.constant 15 : i32
    %34 = vector.broadcast %c15_i32 : i32 to vector<16x128xi32>
    %35 = arith.cmpi eq, %32, %34 : vector<16x128xi32>
    %c0_i32_15 = arith.constant 0 : i32
    %36 = vector.broadcast %c0_i32_15 : i32 to vector<16x128xi32>
    %37 = arith.cmpi eq, %32, %36 : vector<16x128xi32>
    %c127_i32 = arith.constant 127 : i32
    %38 = vector.broadcast %c127_i32 : i32 to vector<16x128xi32>
    %39 = arith.cmpi eq, %33, %38 : vector<16x128xi32>
    %c0_i32_16 = arith.constant 0 : i32
    %40 = vector.broadcast %c0_i32_16 : i32 to vector<16x128xi32>
    %41 = arith.cmpi eq, %33, %40 : vector<16x128xi32>
    %cst_17 = arith.constant 0.000000e+00 : f32
    %42 = vector.broadcast %cst_17 : f32 to vector<5x16x128xf32>
    %c0_18 = arith.constant 0 : index
    %c0_19 = arith.constant 0 : index
    %c0_20 = arith.constant 0 : index
    %43 = vector.load %arg6[%c0_18, %c0_19, %c0_20] : memref<5x16x128xf32, #tpu.memory_space<vmem>>, vector<5x16x128xf32>
    tpu.vector_store %arg6[%c0_18, %c0_19, %c0_20], %42 {strides = array<i32>} : memref<5x16x128xf32, #tpu.memory_space<vmem>>, vector<5x16x128xf32>,
    %c0_i32_21 = arith.constant 0 : i32
    %c3_i32 = arith.constant 3 : i32
    %44 = arith.addi %c0_i32_21, %c3_i32 : i32
    %c1_i32 = arith.constant 1 : i32
    scf.for %arg7 = %c0_i32_21 to %44 step %c1_i32  : i32 {
      %c1_i32_53 = arith.constant 1 : i32
      %99 = arith.muli %arg7, %c1_i32_53 : i32
      %c1_i32_54 = arith.constant 1 : i32
      %100 = arith.addi %c1_i32_54, %99 : i32
      %101 = arith.index_cast %100 : i32 to index
      %c0_55 = arith.constant 0 : index
      %c0_56 = arith.constant 0 : index
      %102 = vector.load %arg5[%101, %c0_55, %c0_56] : memref<4x16x128xf32, #tpu.memory_space<vmem>>, vector<1x16x128xf32>
      %103 = vector.shape_cast %102 : vector<1x16x128xf32> to vector<16x128xf32>
      %104 = vector.broadcast %100 : i32 to vector<16x128xi32>
      %105 = arith.cmpi eq, %6, %104 : vector<16x128xi32>
      %106 = arith.extui %105 : vector<16x128xi1> to vector<16x128xi32>
      %107 = arith.sitofp %106 : vector<16x128xi32> to vector<16x128xf32>
      %c15_i32_57 = arith.constant 15 : i32
      %108 = tpu.dynamic_rotate %103 by %c15_i32_57 dim 0 : vector<16x128xf32>, i32 -> vector<16x128xf32>
      %cst_58 = arith.constant 0x7F800000 : f32
      %109 = vector.broadcast %cst_58 : f32 to vector<16x128xf32>
      %110 = arith.select %35, %109, %108 : vector<16x128xi1>, vector<16x128xf32>
      %111 = arith.minimumf %103, %110 : vector<16x128xf32>
      %c1_i32_59 = arith.constant 1 : i32
      %112 = tpu.dynamic_rotate %103 by %c1_i32_59 dim 0 : vector<16x128xf32>, i32 -> vector<16x128xf32>
      %cst_60 = arith.constant 0x7F800000 : f32
      %113 = vector.broadcast %cst_60 : f32 to vector<16x128xf32>
      %114 = arith.select %37, %113, %112 : vector<16x128xi1>, vector<16x128xf32>
      %115 = arith.minimumf %111, %114 : vector<16x128xf32>
      %c127_i32_61 = arith.constant 127 : i32
      %116 = tpu.dynamic_rotate %103 by %c127_i32_61 dim 1 : vector<16x128xf32>, i32 -> vector<16x128xf32>
      %cst_62 = arith.constant 0x7F800000 : f32
      %117 = vector.broadcast %cst_62 : f32 to vector<16x128xf32>
      %118 = arith.select %39, %117, %116 : vector<16x128xi1>, vector<16x128xf32>
      %119 = arith.minimumf %103, %118 : vector<16x128xf32>
      %c1_i32_63 = arith.constant 1 : i32
      %120 = tpu.dynamic_rotate %103 by %c1_i32_63 dim 1 : vector<16x128xf32>, i32 -> vector<16x128xf32>
      %cst_64 = arith.constant 0x7F800000 : f32
      %121 = vector.broadcast %cst_64 : f32 to vector<16x128xf32>
      %122 = arith.select %41, %121, %120 : vector<16x128xi1>, vector<16x128xf32>
      %123 = arith.minimumf %119, %122 : vector<16x128xf32>
      %124 = arith.minimumf %115, %123 : vector<16x128xf32>
      %c15_i32_65 = arith.constant 15 : i32
      %125 = tpu.dynamic_rotate %124 by %c15_i32_65 dim 0 : vector<16x128xf32>, i32 -> vector<16x128xf32>
      %cst_66 = arith.constant 0xFF800000 : f32
      %126 = vector.broadcast %cst_66 : f32 to vector<16x128xf32>
      %127 = arith.select %35, %126, %125 : vector<16x128xi1>, vector<16x128xf32>
      %128 = arith.maximumf %124, %127 : vector<16x128xf32>
      %c1_i32_67 = arith.constant 1 : i32
      %129 = tpu.dynamic_rotate %124 by %c1_i32_67 dim 0 : vector<16x128xf32>, i32 -> vector<16x128xf32>
      %cst_68 = arith.constant 0xFF800000 : f32
      %130 = vector.broadcast %cst_68 : f32 to vector<16x128xf32>
      %131 = arith.select %37, %130, %129 : vector<16x128xi1>, vector<16x128xf32>
      %132 = arith.maximumf %128, %131 : vector<16x128xf32>
      %c127_i32_69 = arith.constant 127 : i32
      %133 = tpu.dynamic_rotate %132 by %c127_i32_69 dim 1 : vector<16x128xf32>, i32 -> vector<16x128xf32>
      %cst_70 = arith.constant 0xFF800000 : f32
      %134 = vector.broadcast %cst_70 : f32 to vector<16x128xf32>
      %135 = arith.select %39, %134, %133 : vector<16x128xi1>, vector<16x128xf32>
      %136 = arith.maximumf %132, %135 : vector<16x128xf32>
      %c1_i32_71 = arith.constant 1 : i32
      %137 = tpu.dynamic_rotate %132 by %c1_i32_71 dim 1 : vector<16x128xf32>, i32 -> vector<16x128xf32>
      %cst_72 = arith.constant 0xFF800000 : f32
      %138 = vector.broadcast %cst_72 : f32 to vector<16x128xf32>
      %139 = arith.select %41, %138, %137 : vector<16x128xi1>, vector<16x128xf32>
      %140 = arith.maximumf %136, %139 : vector<16x128xf32>
      %141 = arith.subf %103, %140 : vector<16x128xf32>
      %cst_73 = arith.constant 0.000000e+00 : f32
      %142 = vector.broadcast %cst_73 : f32 to vector<16x128xf32>
      %143 = arith.maximumf %141, %142 : vector<16x128xf32>
      %c15_i32_74 = arith.constant 15 : i32
      %144 = tpu.dynamic_rotate %124 by %c15_i32_74 dim 0 : vector<16x128xf32>, i32 -> vector<16x128xf32>
      %cst_75 = arith.constant 0x7F800000 : f32
      %145 = vector.broadcast %cst_75 : f32 to vector<16x128xf32>
      %146 = arith.select %35, %145, %144 : vector<16x128xi1>, vector<16x128xf32>
      %147 = arith.minimumf %124, %146 : vector<16x128xf32>
      %c1_i32_76 = arith.constant 1 : i32
      %148 = tpu.dynamic_rotate %124 by %c1_i32_76 dim 0 : vector<16x128xf32>, i32 -> vector<16x128xf32>
      %cst_77 = arith.constant 0x7F800000 : f32
      %149 = vector.broadcast %cst_77 : f32 to vector<16x128xf32>
      %150 = arith.select %37, %149, %148 : vector<16x128xi1>, vector<16x128xf32>
      %151 = arith.minimumf %147, %150 : vector<16x128xf32>
      %c127_i32_78 = arith.constant 127 : i32
      %152 = tpu.dynamic_rotate %124 by %c127_i32_78 dim 1 : vector<16x128xf32>, i32 -> vector<16x128xf32>
      %cst_79 = arith.constant 0x7F800000 : f32
      %153 = vector.broadcast %cst_79 : f32 to vector<16x128xf32>
      %154 = arith.select %39, %153, %152 : vector<16x128xi1>, vector<16x128xf32>
      %155 = arith.minimumf %124, %154 : vector<16x128xf32>
      %c1_i32_80 = arith.constant 1 : i32
      %156 = tpu.dynamic_rotate %124 by %c1_i32_80 dim 1 : vector<16x128xf32>, i32 -> vector<16x128xf32>
      %cst_81 = arith.constant 0x7F800000 : f32
      %157 = vector.broadcast %cst_81 : f32 to vector<16x128xf32>
      %158 = arith.select %41, %157, %156 : vector<16x128xi1>, vector<16x128xf32>
      %159 = arith.minimumf %155, %158 : vector<16x128xf32>
      %160 = arith.minimumf %151, %159 : vector<16x128xf32>
      %c15_i32_82 = arith.constant 15 : i32
      %161 = tpu.dynamic_rotate %160 by %c15_i32_82 dim 0 : vector<16x128xf32>, i32 -> vector<16x128xf32>
      %cst_83 = arith.constant 0xFF800000 : f32
      %162 = vector.broadcast %cst_83 : f32 to vector<16x128xf32>
      %163 = arith.select %35, %162, %161 : vector<16x128xi1>, vector<16x128xf32>
      %164 = arith.maximumf %160, %163 : vector<16x128xf32>
      %c1_i32_84 = arith.constant 1 : i32
      %165 = tpu.dynamic_rotate %160 by %c1_i32_84 dim 0 : vector<16x128xf32>, i32 -> vector<16x128xf32>
      %cst_85 = arith.constant 0xFF800000 : f32
      %166 = vector.broadcast %cst_85 : f32 to vector<16x128xf32>
      %167 = arith.select %37, %166, %165 : vector<16x128xi1>, vector<16x128xf32>
      %168 = arith.maximumf %164, %167 : vector<16x128xf32>
      %c127_i32_86 = arith.constant 127 : i32
      %169 = tpu.dynamic_rotate %168 by %c127_i32_86 dim 1 : vector<16x128xf32>, i32 -> vector<16x128xf32>
      %cst_87 = arith.constant 0xFF800000 : f32
      %170 = vector.broadcast %cst_87 : f32 to vector<16x128xf32>
      %171 = arith.select %39, %170, %169 : vector<16x128xi1>, vector<16x128xf32>
      %172 = arith.maximumf %168, %171 : vector<16x128xf32>
      %c1_i32_88 = arith.constant 1 : i32
      %173 = tpu.dynamic_rotate %168 by %c1_i32_88 dim 1 : vector<16x128xf32>, i32 -> vector<16x128xf32>
      %cst_89 = arith.constant 0xFF800000 : f32
      %174 = vector.broadcast %cst_89 : f32 to vector<16x128xf32>
      %175 = arith.select %41, %174, %173 : vector<16x128xi1>, vector<16x128xf32>
      %176 = arith.maximumf %172, %175 : vector<16x128xf32>
      %177 = arith.subf %124, %176 : vector<16x128xf32>
      %cst_90 = arith.constant 0.000000e+00 : f32
      %178 = vector.broadcast %cst_90 : f32 to vector<16x128xf32>
      %179 = arith.maximumf %177, %178 : vector<16x128xf32>
      %180 = arith.mulf %143, %179 : vector<16x128xf32>
      %181 = arith.subf %179, %180 : vector<16x128xf32>
      %cst_91 = arith.constant 0.000000e+00 : f32
      %182 = vector.broadcast %cst_91 : f32 to vector<16x128xf32>
      %183 = arith.maximumf %181, %182 : vector<16x128xf32>
      %184 = arith.addf %143, %183 : vector<16x128xf32>
      %c15_i32_92 = arith.constant 15 : i32
      %185 = tpu.dynamic_rotate %160 by %c15_i32_92 dim 0 : vector<16x128xf32>, i32 -> vector<16x128xf32>
      %cst_93 = arith.constant 0x7F800000 : f32
      %186 = vector.broadcast %cst_93 : f32 to vector<16x128xf32>
      %187 = arith.select %35, %186, %185 : vector<16x128xi1>, vector<16x128xf32>
      %188 = arith.minimumf %160, %187 : vector<16x128xf32>
      %c1_i32_94 = arith.constant 1 : i32
      %189 = tpu.dynamic_rotate %160 by %c1_i32_94 dim 0 : vector<16x128xf32>, i32 -> vector<16x128xf32>
      %cst_95 = arith.constant 0x7F800000 : f32
      %190 = vector.broadcast %cst_95 : f32 to vector<16x128xf32>
      %191 = arith.select %37, %190, %189 : vector<16x128xi1>, vector<16x128xf32>
      %192 = arith.minimumf %188, %191 : vector<16x128xf32>
      %c127_i32_96 = arith.constant 127 : i32
      %193 = tpu.dynamic_rotate %160 by %c127_i32_96 dim 1 : vector<16x128xf32>, i32 -> vector<16x128xf32>
      %cst_97 = arith.constant 0x7F800000 : f32
      %194 = vector.broadcast %cst_97 : f32 to vector<16x128xf32>
      %195 = arith.select %39, %194, %193 : vector<16x128xi1>, vector<16x128xf32>
      %196 = arith.minimumf %160, %195 : vector<16x128xf32>
      %c1_i32_98 = arith.constant 1 : i32
      %197 = tpu.dynamic_rotate %160 by %c1_i32_98 dim 1 : vector<16x128xf32>, i32 -> vector<16x128xf32>
      %cst_99 = arith.constant 0x7F800000 : f32
      %198 = vector.broadcast %cst_99 : f32 to vector<16x128xf32>
      %199 = arith.select %41, %198, %197 : vector<16x128xi1>, vector<16x128xf32>
      %200 = arith.minimumf %196, %199 : vector<16x128xf32>
      %201 = arith.minimumf %192, %200 : vector<16x128xf32>
      %c15_i32_100 = arith.constant 15 : i32
      %202 = tpu.dynamic_rotate %201 by %c15_i32_100 dim 0 : vector<16x128xf32>, i32 -> vector<16x128xf32>
      %cst_101 = arith.constant 0xFF800000 : f32
      %203 = vector.broadcast %cst_101 : f32 to vector<16x128xf32>
      %204 = arith.select %35, %203, %202 : vector<16x128xi1>, vector<16x128xf32>
      %205 = arith.maximumf %201, %204 : vector<16x128xf32>
      %c1_i32_102 = arith.constant 1 : i32
      %206 = tpu.dynamic_rotate %201 by %c1_i32_102 dim 0 : vector<16x128xf32>, i32 -> vector<16x128xf32>
      %cst_103 = arith.constant 0xFF800000 : f32
      %207 = vector.broadcast %cst_103 : f32 to vector<16x128xf32>
      %208 = arith.select %37, %207, %206 : vector<16x128xi1>, vector<16x128xf32>
      %209 = arith.maximumf %205, %208 : vector<16x128xf32>
      %c127_i32_104 = arith.constant 127 : i32
      %210 = tpu.dynamic_rotate %209 by %c127_i32_104 dim 1 : vector<16x128xf32>, i32 -> vector<16x128xf32>
      %cst_105 = arith.constant 0xFF800000 : f32
      %211 = vector.broadcast %cst_105 : f32 to vector<16x128xf32>
      %212 = arith.select %39, %211, %210 : vector<16x128xi1>, vector<16x128xf32>
      %213 = arith.maximumf %209, %212 : vector<16x128xf32>
      %c1_i32_106 = arith.constant 1 : i32
      %214 = tpu.dynamic_rotate %209 by %c1_i32_106 dim 1 : vector<16x128xf32>, i32 -> vector<16x128xf32>
      %cst_107 = arith.constant 0xFF800000 : f32
      %215 = vector.broadcast %cst_107 : f32 to vector<16x128xf32>
      %216 = arith.select %41, %215, %214 : vector<16x128xi1>, vector<16x128xf32>
      %217 = arith.maximumf %213, %216 : vector<16x128xf32>
      %218 = arith.subf %160, %217 : vector<16x128xf32>
      %cst_108 = arith.constant 0.000000e+00 : f32
      %219 = vector.broadcast %cst_108 : f32 to vector<16x128xf32>
      %220 = arith.maximumf %218, %219 : vector<16x128xf32>
      %221 = arith.mulf %184, %220 : vector<16x128xf32>
      %222 = arith.subf %220, %221 : vector<16x128xf32>
      %cst_109 = arith.constant 0.000000e+00 : f32
      %223 = vector.broadcast %cst_109 : f32 to vector<16x128xf32>
      %224 = arith.maximumf %222, %223 : vector<16x128xf32>
      %225 = arith.addf %184, %224 : vector<16x128xf32>
      %c15_i32_110 = arith.constant 15 : i32
      %226 = tpu.dynamic_rotate %201 by %c15_i32_110 dim 0 : vector<16x128xf32>, i32 -> vector<16x128xf32>
      %cst_111 = arith.constant 0x7F800000 : f32
      %227 = vector.broadcast %cst_111 : f32 to vector<16x128xf32>
      %228 = arith.select %35, %227, %226 : vector<16x128xi1>, vector<16x128xf32>
      %229 = arith.minimumf %201, %228 : vector<16x128xf32>
      %c1_i32_112 = arith.constant 1 : i32
      %230 = tpu.dynamic_rotate %201 by %c1_i32_112 dim 0 : vector<16x128xf32>, i32 -> vector<16x128xf32>
      %cst_113 = arith.constant 0x7F800000 : f32
      %231 = vector.broadcast %cst_113 : f32 to vector<16x128xf32>
      %232 = arith.select %37, %231, %230 : vector<16x128xi1>, vector<16x128xf32>
      %233 = arith.minimumf %229, %232 : vector<16x128xf32>
      %c127_i32_114 = arith.constant 127 : i32
      %234 = tpu.dynamic_rotate %201 by %c127_i32_114 dim 1 : vector<16x128xf32>, i32 -> vector<16x128xf32>
      %cst_115 = arith.constant 0x7F800000 : f32
      %235 = vector.broadcast %cst_115 : f32 to vector<16x128xf32>
      %236 = arith.select %39, %235, %234 : vector<16x128xi1>, vector<16x128xf32>
      %237 = arith.minimumf %201, %236 : vector<16x128xf32>
      %c1_i32_116 = arith.constant 1 : i32
      %238 = tpu.dynamic_rotate %201 by %c1_i32_116 dim 1 : vector<16x128xf32>, i32 -> vector<16x128xf32>
      %cst_117 = arith.constant 0x7F800000 : f32
      %239 = vector.broadcast %cst_117 : f32 to vector<16x128xf32>
      %240 = arith.select %41, %239, %238 : vector<16x128xi1>, vector<16x128xf32>
      %241 = arith.minimumf %237, %240 : vector<16x128xf32>
      %242 = arith.minimumf %233, %241 : vector<16x128xf32>
      %c15_i32_118 = arith.constant 15 : i32
      %243 = tpu.dynamic_rotate %242 by %c15_i32_118 dim 0 : vector<16x128xf32>, i32 -> vector<16x128xf32>
      %cst_119 = arith.constant 0xFF800000 : f32
      %244 = vector.broadcast %cst_119 : f32 to vector<16x128xf32>
      %245 = arith.select %35, %244, %243 : vector<16x128xi1>, vector<16x128xf32>
      %246 = arith.maximumf %242, %245 : vector<16x128xf32>
      %c1_i32_120 = arith.constant 1 : i32
      %247 = tpu.dynamic_rotate %242 by %c1_i32_120 dim 0 : vector<16x128xf32>, i32 -> vector<16x128xf32>
      %cst_121 = arith.constant 0xFF800000 : f32
      %248 = vector.broadcast %cst_121 : f32 to vector<16x128xf32>
      %249 = arith.select %37, %248, %247 : vector<16x128xi1>, vector<16x128xf32>
      %250 = arith.maximumf %246, %249 : vector<16x128xf32>
      %c127_i32_122 = arith.constant 127 : i32
      %251 = tpu.dynamic_rotate %250 by %c127_i32_122 dim 1 : vector<16x128xf32>, i32 -> vector<16x128xf32>
      %cst_123 = arith.constant 0xFF800000 : f32
      %252 = vector.broadcast %cst_123 : f32 to vector<16x128xf32>
      %253 = arith.select %39, %252, %251 : vector<16x128xi1>, vector<16x128xf32>
      %254 = arith.maximumf %250, %253 : vector<16x128xf32>
      %c1_i32_124 = arith.constant 1 : i32
      %255 = tpu.dynamic_rotate %250 by %c1_i32_124 dim 1 : vector<16x128xf32>, i32 -> vector<16x128xf32>
      %cst_125 = arith.constant 0xFF800000 : f32
      %256 = vector.broadcast %cst_125 : f32 to vector<16x128xf32>
      %257 = arith.select %41, %256, %255 : vector<16x128xi1>, vector<16x128xf32>
      %258 = arith.maximumf %254, %257 : vector<16x128xf32>
      %259 = arith.subf %201, %258 : vector<16x128xf32>
      %cst_126 = arith.constant 0.000000e+00 : f32
      %260 = vector.broadcast %cst_126 : f32 to vector<16x128xf32>
      %261 = arith.maximumf %259, %260 : vector<16x128xf32>
      %262 = arith.mulf %225, %261 : vector<16x128xf32>
      %263 = arith.subf %261, %262 : vector<16x128xf32>
      %cst_127 = arith.constant 0.000000e+00 : f32
      %264 = vector.broadcast %cst_127 : f32 to vector<16x128xf32>
      %265 = arith.maximumf %263, %264 : vector<16x128xf32>
      %266 = arith.addf %225, %265 : vector<16x128xf32>
      %c15_i32_128 = arith.constant 15 : i32
      %267 = tpu.dynamic_rotate %107 by %c15_i32_128 dim 0 : vector<16x128xf32>, i32 -> vector<16x128xf32>
      %cst_129 = arith.constant 0x7F800000 : f32
      %268 = vector.broadcast %cst_129 : f32 to vector<16x128xf32>
      %269 = arith.select %35, %268, %267 : vector<16x128xi1>, vector<16x128xf32>
      %270 = arith.minimumf %107, %269 : vector<16x128xf32>
      %c1_i32_130 = arith.constant 1 : i32
      %271 = tpu.dynamic_rotate %107 by %c1_i32_130 dim 0 : vector<16x128xf32>, i32 -> vector<16x128xf32>
      %cst_131 = arith.constant 0x7F800000 : f32
      %272 = vector.broadcast %cst_131 : f32 to vector<16x128xf32>
      %273 = arith.select %37, %272, %271 : vector<16x128xi1>, vector<16x128xf32>
      %274 = arith.minimumf %270, %273 : vector<16x128xf32>
      %c127_i32_132 = arith.constant 127 : i32
      %275 = tpu.dynamic_rotate %107 by %c127_i32_132 dim 1 : vector<16x128xf32>, i32 -> vector<16x128xf32>
      %cst_133 = arith.constant 0x7F800000 : f32
      %276 = vector.broadcast %cst_133 : f32 to vector<16x128xf32>
      %277 = arith.select %39, %276, %275 : vector<16x128xi1>, vector<16x128xf32>
      %278 = arith.minimumf %107, %277 : vector<16x128xf32>
      %c1_i32_134 = arith.constant 1 : i32
      %279 = tpu.dynamic_rotate %107 by %c1_i32_134 dim 1 : vector<16x128xf32>, i32 -> vector<16x128xf32>
      %cst_135 = arith.constant 0x7F800000 : f32
      %280 = vector.broadcast %cst_135 : f32 to vector<16x128xf32>
      %281 = arith.select %41, %280, %279 : vector<16x128xi1>, vector<16x128xf32>
      %282 = arith.minimumf %278, %281 : vector<16x128xf32>
      %283 = arith.minimumf %274, %282 : vector<16x128xf32>
      %c15_i32_136 = arith.constant 15 : i32
      %284 = tpu.dynamic_rotate %283 by %c15_i32_136 dim 0 : vector<16x128xf32>, i32 -> vector<16x128xf32>
      %cst_137 = arith.constant 0xFF800000 : f32
      %285 = vector.broadcast %cst_137 : f32 to vector<16x128xf32>
      %286 = arith.select %35, %285, %284 : vector<16x128xi1>, vector<16x128xf32>
      %287 = arith.maximumf %283, %286 : vector<16x128xf32>
      %c1_i32_138 = arith.constant 1 : i32
      %288 = tpu.dynamic_rotate %283 by %c1_i32_138 dim 0 : vector<16x128xf32>, i32 -> vector<16x128xf32>
      %cst_139 = arith.constant 0xFF800000 : f32
      %289 = vector.broadcast %cst_139 : f32 to vector<16x128xf32>
      %290 = arith.select %37, %289, %288 : vector<16x128xi1>, vector<16x128xf32>
      %291 = arith.maximumf %287, %290 : vector<16x128xf32>
      %c127_i32_140 = arith.constant 127 : i32
      %292 = tpu.dynamic_rotate %291 by %c127_i32_140 dim 1 : vector<16x128xf32>, i32 -> vector<16x128xf32>
      %cst_141 = arith.constant 0xFF800000 : f32
      %293 = vector.broadcast %cst_141 : f32 to vector<16x128xf32>
      %294 = arith.select %39, %293, %292 : vector<16x128xi1>, vector<16x128xf32>
      %295 = arith.maximumf %291, %294 : vector<16x128xf32>
      %c1_i32_142 = arith.constant 1 : i32
      %296 = tpu.dynamic_rotate %291 by %c1_i32_142 dim 1 : vector<16x128xf32>, i32 -> vector<16x128xf32>
      %cst_143 = arith.constant 0xFF800000 : f32
      %297 = vector.broadcast %cst_143 : f32 to vector<16x128xf32>
      %298 = arith.select %41, %297, %296 : vector<16x128xi1>, vector<16x128xf32>
      %299 = arith.maximumf %295, %298 : vector<16x128xf32>
      %300 = arith.subf %107, %299 : vector<16x128xf32>
      %cst_144 = arith.constant 0.000000e+00 : f32
      %301 = vector.broadcast %cst_144 : f32 to vector<16x128xf32>
      %302 = arith.maximumf %300, %301 : vector<16x128xf32>
      %c15_i32_145 = arith.constant 15 : i32
      %303 = tpu.dynamic_rotate %283 by %c15_i32_145 dim 0 : vector<16x128xf32>, i32 -> vector<16x128xf32>
      %cst_146 = arith.constant 0x7F800000 : f32
      %304 = vector.broadcast %cst_146 : f32 to vector<16x128xf32>
      %305 = arith.select %35, %304, %303 : vector<16x128xi1>, vector<16x128xf32>
      %306 = arith.minimumf %283, %305 : vector<16x128xf32>
      %c1_i32_147 = arith.constant 1 : i32
      %307 = tpu.dynamic_rotate %283 by %c1_i32_147 dim 0 : vector<16x128xf32>, i32 -> vector<16x128xf32>
      %cst_148 = arith.constant 0x7F800000 : f32
      %308 = vector.broadcast %cst_148 : f32 to vector<16x128xf32>
      %309 = arith.select %37, %308, %307 : vector<16x128xi1>, vector<16x128xf32>
      %310 = arith.minimumf %306, %309 : vector<16x128xf32>
      %c127_i32_149 = arith.constant 127 : i32
      %311 = tpu.dynamic_rotate %283 by %c127_i32_149 dim 1 : vector<16x128xf32>, i32 -> vector<16x128xf32>
      %cst_150 = arith.constant 0x7F800000 : f32
      %312 = vector.broadcast %cst_150 : f32 to vector<16x128xf32>
      %313 = arith.select %39, %312, %311 : vector<16x128xi1>, vector<16x128xf32>
      %314 = arith.minimumf %283, %313 : vector<16x128xf32>
      %c1_i32_151 = arith.constant 1 : i32
      %315 = tpu.dynamic_rotate %283 by %c1_i32_151 dim 1 : vector<16x128xf32>, i32 -> vector<16x128xf32>
      %cst_152 = arith.constant 0x7F800000 : f32
      %316 = vector.broadcast %cst_152 : f32 to vector<16x128xf32>
      %317 = arith.select %41, %316, %315 : vector<16x128xi1>, vector<16x128xf32>
      %318 = arith.minimumf %314, %317 : vector<16x128xf32>
      %319 = arith.minimumf %310, %318 : vector<16x128xf32>
      %c15_i32_153 = arith.constant 15 : i32
      %320 = tpu.dynamic_rotate %319 by %c15_i32_153 dim 0 : vector<16x128xf32>, i32 -> vector<16x128xf32>
      %cst_154 = arith.constant 0xFF800000 : f32
      %321 = vector.broadcast %cst_154 : f32 to vector<16x128xf32>
      %322 = arith.select %35, %321, %320 : vector<16x128xi1>, vector<16x128xf32>
      %323 = arith.maximumf %319, %322 : vector<16x128xf32>
      %c1_i32_155 = arith.constant 1 : i32
      %324 = tpu.dynamic_rotate %319 by %c1_i32_155 dim 0 : vector<16x128xf32>, i32 -> vector<16x128xf32>
      %cst_156 = arith.constant 0xFF800000 : f32
      %325 = vector.broadcast %cst_156 : f32 to vector<16x128xf32>
      %326 = arith.select %37, %325, %324 : vector<16x128xi1>, vector<16x128xf32>
      %327 = arith.maximumf %323, %326 : vector<16x128xf32>
      %c127_i32_157 = arith.constant 127 : i32
      %328 = tpu.dynamic_rotate %327 by %c127_i32_157 dim 1 : vector<16x128xf32>, i32 -> vector<16x128xf32>
      %cst_158 = arith.constant 0xFF800000 : f32
      %329 = vector.broadcast %cst_158 : f32 to vector<16x128xf32>
      %330 = arith.select %39, %329, %328 : vector<16x128xi1>, vector<16x128xf32>
      %331 = arith.maximumf %327, %330 : vector<16x128xf32>
      %c1_i32_159 = arith.constant 1 : i32
      %332 = tpu.dynamic_rotate %327 by %c1_i32_159 dim 1 : vector<16x128xf32>, i32 -> vector<16x128xf32>
      %cst_160 = arith.constant 0xFF800000 : f32
      %333 = vector.broadcast %cst_160 : f32 to vector<16x128xf32>
      %334 = arith.select %41, %333, %332 : vector<16x128xi1>, vector<16x128xf32>
      %335 = arith.maximumf %331, %334 : vector<16x128xf32>
      %336 = arith.subf %283, %335 : vector<16x128xf32>
      %cst_161 = arith.constant 0.000000e+00 : f32
      %337 = vector.broadcast %cst_161 : f32 to vector<16x128xf32>
      %338 = arith.maximumf %336, %337 : vector<16x128xf32>
      %339 = arith.mulf %302, %338 : vector<16x128xf32>
      %340 = arith.subf %338, %339 : vector<16x128xf32>
      %cst_162 = arith.constant 0.000000e+00 : f32
      %341 = vector.broadcast %cst_162 : f32 to vector<16x128xf32>
      %342 = arith.maximumf %340, %341 : vector<16x128xf32>
      %343 = arith.addf %302, %342 : vector<16x128xf32>
      %c15_i32_163 = arith.constant 15 : i32
      %344 = tpu.dynamic_rotate %319 by %c15_i32_163 dim 0 : vector<16x128xf32>, i32 -> vector<16x128xf32>
      %cst_164 = arith.constant 0x7F800000 : f32
      %345 = vector.broadcast %cst_164 : f32 to vector<16x128xf32>
      %346 = arith.select %35, %345, %344 : vector<16x128xi1>, vector<16x128xf32>
      %347 = arith.minimumf %319, %346 : vector<16x128xf32>
      %c1_i32_165 = arith.constant 1 : i32
      %348 = tpu.dynamic_rotate %319 by %c1_i32_165 dim 0 : vector<16x128xf32>, i32 -> vector<16x128xf32>
      %cst_166 = arith.constant 0x7F800000 : f32
      %349 = vector.broadcast %cst_166 : f32 to vector<16x128xf32>
      %350 = arith.select %37, %349, %348 : vector<16x128xi1>, vector<16x128xf32>
      %351 = arith.minimumf %347, %350 : vector<16x128xf32>
      %c127_i32_167 = arith.constant 127 : i32
      %352 = tpu.dynamic_rotate %319 by %c127_i32_167 dim 1 : vector<16x128xf32>, i32 -> vector<16x128xf32>
      %cst_168 = arith.constant 0x7F800000 : f32
      %353 = vector.broadcast %cst_168 : f32 to vector<16x128xf32>
      %354 = arith.select %39, %353, %352 : vector<16x128xi1>, vector<16x128xf32>
      %355 = arith.minimumf %319, %354 : vector<16x128xf32>
      %c1_i32_169 = arith.constant 1 : i32
      %356 = tpu.dynamic_rotate %319 by %c1_i32_169 dim 1 : vector<16x128xf32>, i32 -> vector<16x128xf32>
      %cst_170 = arith.constant 0x7F800000 : f32
      %357 = vector.broadcast %cst_170 : f32 to vector<16x128xf32>
      %358 = arith.select %41, %357, %356 : vector<16x128xi1>, vector<16x128xf32>
      %359 = arith.minimumf %355, %358 : vector<16x128xf32>
      %360 = arith.minimumf %351, %359 : vector<16x128xf32>
      %c15_i32_171 = arith.constant 15 : i32
      %361 = tpu.dynamic_rotate %360 by %c15_i32_171 dim 0 : vector<16x128xf32>, i32 -> vector<16x128xf32>
      %cst_172 = arith.constant 0xFF800000 : f32
      %362 = vector.broadcast %cst_172 : f32 to vector<16x128xf32>
      %363 = arith.select %35, %362, %361 : vector<16x128xi1>, vector<16x128xf32>
      %364 = arith.maximumf %360, %363 : vector<16x128xf32>
      %c1_i32_173 = arith.constant 1 : i32
      %365 = tpu.dynamic_rotate %360 by %c1_i32_173 dim 0 : vector<16x128xf32>, i32 -> vector<16x128xf32>
      %cst_174 = arith.constant 0xFF800000 : f32
      %366 = vector.broadcast %cst_174 : f32 to vector<16x128xf32>
      %367 = arith.select %37, %366, %365 : vector<16x128xi1>, vector<16x128xf32>
      %368 = arith.maximumf %364, %367 : vector<16x128xf32>
      %c127_i32_175 = arith.constant 127 : i32
      %369 = tpu.dynamic_rotate %368 by %c127_i32_175 dim 1 : vector<16x128xf32>, i32 -> vector<16x128xf32>
      %cst_176 = arith.constant 0xFF800000 : f32
      %370 = vector.broadcast %cst_176 : f32 to vector<16x128xf32>
      %371 = arith.select %39, %370, %369 : vector<16x128xi1>, vector<16x128xf32>
      %372 = arith.maximumf %368, %371 : vector<16x128xf32>
      %c1_i32_177 = arith.constant 1 : i32
      %373 = tpu.dynamic_rotate %368 by %c1_i32_177 dim 1 : vector<16x128xf32>, i32 -> vector<16x128xf32>
      %cst_178 = arith.constant 0xFF800000 : f32
      %374 = vector.broadcast %cst_178 : f32 to vector<16x128xf32>
      %375 = arith.select %41, %374, %373 : vector<16x128xi1>, vector<16x128xf32>
      %376 = arith.maximumf %372, %375 : vector<16x128xf32>
      %377 = arith.subf %319, %376 : vector<16x128xf32>
      %cst_179 = arith.constant 0.000000e+00 : f32
      %378 = vector.broadcast %cst_179 : f32 to vector<16x128xf32>
      %379 = arith.maximumf %377, %378 : vector<16x128xf32>
      %380 = arith.mulf %343, %379 : vector<16x128xf32>
      %381 = arith.subf %379, %380 : vector<16x128xf32>
      %cst_180 = arith.constant 0.000000e+00 : f32
      %382 = vector.broadcast %cst_180 : f32 to vector<16x128xf32>
      %383 = arith.maximumf %381, %382 : vector<16x128xf32>
      %384 = arith.addf %343, %383 : vector<16x128xf32>
      %c15_i32_181 = arith.constant 15 : i32
      %385 = tpu.dynamic_rotate %360 by %c15_i32_181 dim 0 : vector<16x128xf32>, i32 -> vector<16x128xf32>
      %cst_182 = arith.constant 0x7F800000 : f32
      %386 = vector.broadcast %cst_182 : f32 to vector<16x128xf32>
      %387 = arith.select %35, %386, %385 : vector<16x128xi1>, vector<16x128xf32>
      %388 = arith.minimumf %360, %387 : vector<16x128xf32>
      %c1_i32_183 = arith.constant 1 : i32
      %389 = tpu.dynamic_rotate %360 by %c1_i32_183 dim 0 : vector<16x128xf32>, i32 -> vector<16x128xf32>
      %cst_184 = arith.constant 0x7F800000 : f32
      %390 = vector.broadcast %cst_184 : f32 to vector<16x128xf32>
      %391 = arith.select %37, %390, %389 : vector<16x128xi1>, vector<16x128xf32>
      %392 = arith.minimumf %388, %391 : vector<16x128xf32>
      %c127_i32_185 = arith.constant 127 : i32
      %393 = tpu.dynamic_rotate %360 by %c127_i32_185 dim 1 : vector<16x128xf32>, i32 -> vector<16x128xf32>
      %cst_186 = arith.constant 0x7F800000 : f32
      %394 = vector.broadcast %cst_186 : f32 to vector<16x128xf32>
      %395 = arith.select %39, %394, %393 : vector<16x128xi1>, vector<16x128xf32>
      %396 = arith.minimumf %360, %395 : vector<16x128xf32>
      %c1_i32_187 = arith.constant 1 : i32
      %397 = tpu.dynamic_rotate %360 by %c1_i32_187 dim 1 : vector<16x128xf32>, i32 -> vector<16x128xf32>
      %cst_188 = arith.constant 0x7F800000 : f32
      %398 = vector.broadcast %cst_188 : f32 to vector<16x128xf32>
      %399 = arith.select %41, %398, %397 : vector<16x128xi1>, vector<16x128xf32>
      %400 = arith.minimumf %396, %399 : vector<16x128xf32>
      %401 = arith.minimumf %392, %400 : vector<16x128xf32>
      %c15_i32_189 = arith.constant 15 : i32
      %402 = tpu.dynamic_rotate %401 by %c15_i32_189 dim 0 : vector<16x128xf32>, i32 -> vector<16x128xf32>
      %cst_190 = arith.constant 0xFF800000 : f32
      %403 = vector.broadcast %cst_190 : f32 to vector<16x128xf32>
      %404 = arith.select %35, %403, %402 : vector<16x128xi1>, vector<16x128xf32>
      %405 = arith.maximumf %401, %404 : vector<16x128xf32>
      %c1_i32_191 = arith.constant 1 : i32
      %406 = tpu.dynamic_rotate %401 by %c1_i32_191 dim 0 : vector<16x128xf32>, i32 -> vector<16x128xf32>
      %cst_192 = arith.constant 0xFF800000 : f32
      %407 = vector.broadcast %cst_192 : f32 to vector<16x128xf32>
      %408 = arith.select %37, %407, %406 : vector<16x128xi1>, vector<16x128xf32>
      %409 = arith.maximumf %405, %408 : vector<16x128xf32>
      %c127_i32_193 = arith.constant 127 : i32
      %410 = tpu.dynamic_rotate %409 by %c127_i32_193 dim 1 : vector<16x128xf32>, i32 -> vector<16x128xf32>
      %cst_194 = arith.constant 0xFF800000 : f32
      %411 = vector.broadcast %cst_194 : f32 to vector<16x128xf32>
      %412 = arith.select %39, %411, %410 : vector<16x128xi1>, vector<16x128xf32>
      %413 = arith.maximumf %409, %412 : vector<16x128xf32>
      %c1_i32_195 = arith.constant 1 : i32
      %414 = tpu.dynamic_rotate %409 by %c1_i32_195 dim 1 : vector<16x128xf32>, i32 -> vector<16x128xf32>
      %cst_196 = arith.constant 0xFF800000 : f32
      %415 = vector.broadcast %cst_196 : f32 to vector<16x128xf32>
      %416 = arith.select %41, %415, %414 : vector<16x128xi1>, vector<16x128xf32>
      %417 = arith.maximumf %413, %416 : vector<16x128xf32>
      %418 = arith.subf %360, %417 : vector<16x128xf32>
      %cst_197 = arith.constant 0.000000e+00 : f32
      %419 = vector.broadcast %cst_197 : f32 to vector<16x128xf32>
      %420 = arith.maximumf %418, %419 : vector<16x128xf32>
      %421 = arith.mulf %384, %420 : vector<16x128xf32>
      %422 = arith.subf %420, %421 : vector<16x128xf32>
      %cst_198 = arith.constant 0.000000e+00 : f32
      %423 = vector.broadcast %cst_198 : f32 to vector<16x128xf32>
      %424 = arith.maximumf %422, %423 : vector<16x128xf32>
      %425 = arith.addf %384, %424 : vector<16x128xf32>
      %c0_199 = arith.constant 0 : index
      %c0_200 = arith.constant 0 : index
      %c0_201 = arith.constant 0 : index
      %426 = vector.load %arg6[%c0_199, %c0_200, %c0_201] : memref<5x16x128xf32, #tpu.memory_space<vmem>>, vector<1x16x128xf32>
      %427 = vector.shape_cast %426 : vector<1x16x128xf32> to vector<16x128xf32>
      %428 = arith.mulf %107, %103 : vector<16x128xf32>
      %429 = arith.addf %427, %428 : vector<16x128xf32>
      %c0_202 = arith.constant 0 : index
      %c0_203 = arith.constant 0 : index
      %c0_204 = arith.constant 0 : index
      %430 = vector.load %arg6[%c0_202, %c0_203, %c0_204] : memref<5x16x128xf32, #tpu.memory_space<vmem>>, vector<1x16x128xf32>
      %431 = vector.shape_cast %430 : vector<1x16x128xf32> to vector<16x128xf32>
      %432 = vector.shape_cast %429 : vector<16x128xf32> to vector<1x16x128xf32>
      tpu.vector_store %arg6[%c0_202, %c0_203, %c0_204], %432 {strides = array<i32>} : memref<5x16x128xf32, #tpu.memory_space<vmem>>, vector<1x16x128xf32>,
      %c1_205 = arith.constant 1 : index
      %c0_206 = arith.constant 0 : index
      %c0_207 = arith.constant 0 : index
      %433 = vector.load %arg6[%c1_205, %c0_206, %c0_207] : memref<5x16x128xf32, #tpu.memory_space<vmem>>, vector<1x16x128xf32>
      %434 = vector.shape_cast %433 : vector<1x16x128xf32> to vector<16x128xf32>
      %435 = arith.mulf %266, %107 : vector<16x128xf32>
      %436 = arith.addf %434, %435 : vector<16x128xf32>
      %c1_208 = arith.constant 1 : index
      %c0_209 = arith.constant 0 : index
      %c0_210 = arith.constant 0 : index
      %437 = vector.load %arg6[%c1_208, %c0_209, %c0_210] : memref<5x16x128xf32, #tpu.memory_space<vmem>>, vector<1x16x128xf32>
      %438 = vector.shape_cast %437 : vector<1x16x128xf32> to vector<16x128xf32>
      %439 = vector.shape_cast %436 : vector<16x128xf32> to vector<1x16x128xf32>
      tpu.vector_store %arg6[%c1_208, %c0_209, %c0_210], %439 {strides = array<i32>} : memref<5x16x128xf32, #tpu.memory_space<vmem>>, vector<1x16x128xf32>,
      %c2_211 = arith.constant 2 : index
      %c0_212 = arith.constant 0 : index
      %c0_213 = arith.constant 0 : index
      %440 = vector.load %arg6[%c2_211, %c0_212, %c0_213] : memref<5x16x128xf32, #tpu.memory_space<vmem>>, vector<1x16x128xf32>
      %441 = vector.shape_cast %440 : vector<1x16x128xf32> to vector<16x128xf32>
      %442 = arith.addf %441, %266 : vector<16x128xf32>
      %c2_214 = arith.constant 2 : index
      %c0_215 = arith.constant 0 : index
      %c0_216 = arith.constant 0 : index
      %443 = vector.load %arg6[%c2_214, %c0_215, %c0_216] : memref<5x16x128xf32, #tpu.memory_space<vmem>>, vector<1x16x128xf32>
      %444 = vector.shape_cast %443 : vector<1x16x128xf32> to vector<16x128xf32>
      %445 = vector.shape_cast %442 : vector<16x128xf32> to vector<1x16x128xf32>
      tpu.vector_store %arg6[%c2_214, %c0_215, %c0_216], %445 {strides = array<i32>} : memref<5x16x128xf32, #tpu.memory_space<vmem>>, vector<1x16x128xf32>,
      %c3_217 = arith.constant 3 : index
      %c0_218 = arith.constant 0 : index
      %c0_219 = arith.constant 0 : index
      %446 = vector.load %arg6[%c3_217, %c0_218, %c0_219] : memref<5x16x128xf32, #tpu.memory_space<vmem>>, vector<1x16x128xf32>
      %447 = vector.shape_cast %446 : vector<1x16x128xf32> to vector<16x128xf32>
      %448 = arith.mulf %425, %103 : vector<16x128xf32>
      %449 = arith.addf %447, %448 : vector<16x128xf32>
      %c3_220 = arith.constant 3 : index
      %c0_221 = arith.constant 0 : index
      %c0_222 = arith.constant 0 : index
      %450 = vector.load %arg6[%c3_220, %c0_221, %c0_222] : memref<5x16x128xf32, #tpu.memory_space<vmem>>, vector<1x16x128xf32>
      %451 = vector.shape_cast %450 : vector<1x16x128xf32> to vector<16x128xf32>
      %452 = vector.shape_cast %449 : vector<16x128xf32> to vector<1x16x128xf32>
      tpu.vector_store %arg6[%c3_220, %c0_221, %c0_222], %452 {strides = array<i32>} : memref<5x16x128xf32, #tpu.memory_space<vmem>>, vector<1x16x128xf32>,
      %c4_223 = arith.constant 4 : index
      %c0_224 = arith.constant 0 : index
      %c0_225 = arith.constant 0 : index
      %453 = vector.load %arg6[%c4_223, %c0_224, %c0_225] : memref<5x16x128xf32, #tpu.memory_space<vmem>>, vector<1x16x128xf32>
      %454 = vector.shape_cast %453 : vector<1x16x128xf32> to vector<16x128xf32>
      %455 = arith.addf %454, %425 : vector<16x128xf32>
      %c4_226 = arith.constant 4 : index
      %c0_227 = arith.constant 0 : index
      %c0_228 = arith.constant 0 : index
      %456 = vector.load %arg6[%c4_226, %c0_227, %c0_228] : memref<5x16x128xf32, #tpu.memory_space<vmem>>, vector<1x16x128xf32>
      %457 = vector.shape_cast %456 : vector<1x16x128xf32> to vector<16x128xf32>
      %458 = vector.shape_cast %455 : vector<16x128xf32> to vector<1x16x128xf32>
      tpu.vector_store %arg6[%c4_226, %c0_227, %c0_228], %458 {strides = array<i32>} : memref<5x16x128xf32, #tpu.memory_space<vmem>>, vector<1x16x128xf32>,
    }
    %c3_i32_22 = arith.constant 3 : i32
    %c0_23 = arith.constant 0 : index
    %45 = memref.load %arg4[%c0_23] : memref<7xf32, #tpu.memory_space<smem>>
    %c0_24 = arith.constant 0 : index
    %c0_25 = arith.constant 0 : index
    %c0_26 = arith.constant 0 : index
    %46 = vector.load %arg6[%c0_24, %c0_25, %c0_26] : memref<5x16x128xf32, #tpu.memory_space<vmem>>, vector<1x16x128xf32>
    %47 = vector.shape_cast %46 : vector<1x16x128xf32> to vector<16x128xf32>
    %48 = vector.shape_cast %47 : vector<16x128xf32> to vector<1x16x128xf32>
    %cst_27 = arith.constant dense<0.000000e+00> : vector<1xf32>
    %49 = vector.multi_reduction <add>, %48, %cst_27 [1, 2] : vector<1x16x128xf32> to vector<1xf32>
    %50 = vector.shape_cast %49 : vector<1xf32> to vector<1x1x1xf32>
    %51 = vector.extract %50[0, 0, 0] : f32 from vector<1x1x1xf32>
    %52 = arith.addf %45, %51 : f32
    %c0_28 = arith.constant 0 : index
    %53 = memref.load %arg4[%c0_28] : memref<7xf32, #tpu.memory_space<smem>>
    memref.store %52, %arg4[%c0_28] : memref<7xf32, #tpu.memory_space<smem>>
    %c1 = arith.constant 1 : index
    %54 = memref.load %arg4[%c1] : memref<7xf32, #tpu.memory_space<smem>>
    %55 = arith.addf %54, %25 : f32
    %c1_29 = arith.constant 1 : index
    %56 = memref.load %arg4[%c1_29] : memref<7xf32, #tpu.memory_space<smem>>
    memref.store %55, %arg4[%c1_29] : memref<7xf32, #tpu.memory_space<smem>>
    %c2 = arith.constant 2 : index
    %57 = memref.load %arg4[%c2] : memref<7xf32, #tpu.memory_space<smem>>
    %58 = arith.addf %57, %31 : f32
    %c2_30 = arith.constant 2 : index
    %59 = memref.load %arg4[%c2_30] : memref<7xf32, #tpu.memory_space<smem>>
    memref.store %58, %arg4[%c2_30] : memref<7xf32, #tpu.memory_space<smem>>
    %c3 = arith.constant 3 : index
    %60 = memref.load %arg4[%c3] : memref<7xf32, #tpu.memory_space<smem>>
    %c1_31 = arith.constant 1 : index
    %c0_32 = arith.constant 0 : index
    %c0_33 = arith.constant 0 : index
    %61 = vector.load %arg6[%c1_31, %c0_32, %c0_33] : memref<5x16x128xf32, #tpu.memory_space<vmem>>, vector<1x16x128xf32>
    %62 = vector.shape_cast %61 : vector<1x16x128xf32> to vector<16x128xf32>
    %63 = vector.shape_cast %62 : vector<16x128xf32> to vector<1x16x128xf32>
    %cst_34 = arith.constant dense<0.000000e+00> : vector<1xf32>
    %64 = vector.multi_reduction <add>, %63, %cst_34 [1, 2] : vector<1x16x128xf32> to vector<1xf32>
    %65 = vector.shape_cast %64 : vector<1xf32> to vector<1x1x1xf32>
    %66 = vector.extract %65[0, 0, 0] : f32 from vector<1x1x1xf32>
    %67 = arith.addf %60, %66 : f32
    %c3_35 = arith.constant 3 : index
    %68 = memref.load %arg4[%c3_35] : memref<7xf32, #tpu.memory_space<smem>>
    memref.store %67, %arg4[%c3_35] : memref<7xf32, #tpu.memory_space<smem>>
    %c4 = arith.constant 4 : index
    %69 = memref.load %arg4[%c4] : memref<7xf32, #tpu.memory_space<smem>>
    %c2_36 = arith.constant 2 : index
    %c0_37 = arith.constant 0 : index
    %c0_38 = arith.constant 0 : index
    %70 = vector.load %arg6[%c2_36, %c0_37, %c0_38] : memref<5x16x128xf32, #tpu.memory_space<vmem>>, vector<1x16x128xf32>
    %71 = vector.shape_cast %70 : vector<1x16x128xf32> to vector<16x128xf32>
    %72 = vector.shape_cast %71 : vector<16x128xf32> to vector<1x16x128xf32>
    %cst_39 = arith.constant dense<0.000000e+00> : vector<1xf32>
    %73 = vector.multi_reduction <add>, %72, %cst_39 [1, 2] : vector<1x16x128xf32> to vector<1xf32>
    %74 = vector.shape_cast %73 : vector<1xf32> to vector<1x1x1xf32>
    %75 = vector.extract %74[0, 0, 0] : f32 from vector<1x1x1xf32>
    %76 = arith.addf %69, %75 : f32
    %c4_40 = arith.constant 4 : index
    %77 = memref.load %arg4[%c4_40] : memref<7xf32, #tpu.memory_space<smem>>
    memref.store %76, %arg4[%c4_40] : memref<7xf32, #tpu.memory_space<smem>>
    %c5 = arith.constant 5 : index
    %78 = memref.load %arg4[%c5] : memref<7xf32, #tpu.memory_space<smem>>
    %c3_41 = arith.constant 3 : index
    %c0_42 = arith.constant 0 : index
    %c0_43 = arith.constant 0 : index
    %79 = vector.load %arg6[%c3_41, %c0_42, %c0_43] : memref<5x16x128xf32, #tpu.memory_space<vmem>>, vector<1x16x128xf32>
    %80 = vector.shape_cast %79 : vector<1x16x128xf32> to vector<16x128xf32>
    %81 = vector.shape_cast %80 : vector<16x128xf32> to vector<1x16x128xf32>
    %cst_44 = arith.constant dense<0.000000e+00> : vector<1xf32>
    %82 = vector.multi_reduction <add>, %81, %cst_44 [1, 2] : vector<1x16x128xf32> to vector<1xf32>
    %83 = vector.shape_cast %82 : vector<1xf32> to vector<1x1x1xf32>
    %84 = vector.extract %83[0, 0, 0] : f32 from vector<1x1x1xf32>
    %85 = arith.addf %78, %84 : f32
    %c5_45 = arith.constant 5 : index
    %86 = memref.load %arg4[%c5_45] : memref<7xf32, #tpu.memory_space<smem>>
    memref.store %85, %arg4[%c5_45] : memref<7xf32, #tpu.memory_space<smem>>
    %c6 = arith.constant 6 : index
    %87 = memref.load %arg4[%c6] : memref<7xf32, #tpu.memory_space<smem>>
    %c4_46 = arith.constant 4 : index
    %c0_47 = arith.constant 0 : index
    %c0_48 = arith.constant 0 : index
    %88 = vector.load %arg6[%c4_46, %c0_47, %c0_48] : memref<5x16x128xf32, #tpu.memory_space<vmem>>, vector<1x16x128xf32>
    %89 = vector.shape_cast %88 : vector<1x16x128xf32> to vector<16x128xf32>
    %90 = vector.shape_cast %89 : vector<16x128xf32> to vector<1x16x128xf32>
    %cst_49 = arith.constant dense<0.000000e+00> : vector<1xf32>
    %91 = vector.multi_reduction <add>, %90, %cst_49 [1, 2] : vector<1x16x128xf32> to vector<1xf32>
    %92 = vector.shape_cast %91 : vector<1xf32> to vector<1x1x1xf32>
    %93 = vector.extract %92[0, 0, 0] : f32 from vector<1x1x1xf32>
    %94 = arith.addf %87, %93 : f32
    %c6_50 = arith.constant 6 : index
    %95 = memref.load %arg4[%c6_50] : memref<7xf32, #tpu.memory_space<smem>>
    memref.store %94, %arg4[%c6_50] : memref<7xf32, #tpu.memory_space<smem>>
    %c1_i32_51 = arith.constant 1 : i32
    %96 = arith.cmpi eq, %arg0, %c1_i32_51 : i32
    %97 = arith.extui %96 : i1 to i32
    %c0_i32_52 = arith.constant 0 : i32
    %98 = arith.cmpi ne, %97, %c0_i32_52 : i32
    scf.if %98 {
      %c0_53 = arith.constant 0 : index
      %99 = memref.load %arg4[%c0_53] : memref<7xf32, #tpu.memory_space<smem>>
      %cst_54 = arith.constant 2.000000e+00 : f32
      %100 = arith.mulf %cst_54, %99 : f32
      %cst_55 = arith.constant 1.000000e+00 : f32
      %101 = arith.addf %100, %cst_55 : f32
      %c1_56 = arith.constant 1 : index
      %102 = memref.load %arg4[%c1_56] : memref<7xf32, #tpu.memory_space<smem>>
      %c2_57 = arith.constant 2 : index
      %103 = memref.load %arg4[%c2_57] : memref<7xf32, #tpu.memory_space<smem>>
      %104 = arith.addf %102, %103 : f32
      %cst_58 = arith.constant 1.000000e+00 : f32
      %105 = arith.addf %104, %cst_58 : f32
      %106 = arith.divf %101, %105 : f32
      %cst_59 = arith.constant 1.000000e+00 : f32
      %107 = arith.subf %cst_59, %106 : f32
      %c3_60 = arith.constant 3 : index
      %108 = memref.load %arg4[%c3_60] : memref<7xf32, #tpu.memory_space<smem>>
      %cst_61 = arith.constant 1.000000e+00 : f32
      %109 = arith.addf %108, %cst_61 : f32
      %c4_62 = arith.constant 4 : index
      %110 = memref.load %arg4[%c4_62] : memref<7xf32, #tpu.memory_space<smem>>
      %cst_63 = arith.constant 1.000000e+00 : f32
      %111 = arith.addf %110, %cst_63 : f32
      %112 = arith.divf %109, %111 : f32
      %c5_64 = arith.constant 5 : index
      %113 = memref.load %arg4[%c5_64] : memref<7xf32, #tpu.memory_space<smem>>
      %cst_65 = arith.constant 1.000000e+00 : f32
      %114 = arith.addf %113, %cst_65 : f32
      %c6_66 = arith.constant 6 : index
      %115 = memref.load %arg4[%c6_66] : memref<7xf32, #tpu.memory_space<smem>>
      %cst_67 = arith.constant 1.000000e+00 : f32
      %116 = arith.addf %115, %cst_67 : f32
      %117 = arith.divf %114, %116 : f32
      %118 = arith.mulf %112, %117 : f32
      %cst_68 = arith.constant 2.000000e+00 : f32
      %119 = arith.mulf %cst_68, %118 : f32
      %120 = arith.addf %112, %117 : f32
      %121 = arith.divf %119, %120 : f32
      %cst_69 = arith.constant 1.000000e+00 : f32
      %122 = arith.subf %cst_69, %121 : f32
      %cst_70 = arith.constant 5.000000e-01 : f32
      %123 = arith.mulf %cst_70, %107 : f32
      %cst_71 = arith.constant 5.000000e-01 : f32
      %124 = arith.mulf %cst_71, %122 : f32
      %125 = arith.addf %123, %124 : f32
      %c0_72 = arith.constant 0 : index
      %126 = memref.load %arg3[%c0_72] : memref<1xf32, #tpu.memory_space<smem>>
      memref.store %125, %arg3[%c0_72] : memref<1xf32, #tpu.memory_space<smem>>
    } else {
    }
    return
  }
  func.func @transform_0(%arg0: i32) -> (i32, i32, i32, i32) {
    %c0_i32 = arith.constant 0 : i32
    %c0_i32_0 = arith.constant 0 : i32
    %c0_i32_1 = arith.constant 0 : i32
    %c0_i32_2 = arith.constant 0 : i32
    return %arg0, %c0_i32, %c0_i32_0, %c0_i32_1 : i32, i32, i32, i32
  }
  func.func @transform_1(%arg0: i32) -> (i32, i32, i32) {
    %c0_i32 = arith.constant 0 : i32
    %c0_i32_0 = arith.constant 0 : i32
    %c0_i32_1 = arith.constant 0 : i32
    return %arg0, %c0_i32, %c0_i32_0 : i32, i32, i32
  }
  func.func @transform_2(%arg0: i32) -> i32 {
    %c0_i32 = arith.constant 0 : i32
    %c0_i32_0 = arith.constant 0 : i32
    return %c0_i32 : i32
  }
}

</mosaic_0001>

<bundles_post_ra>
// kernel: tpu_custom_call.1
= control target key start
LH: loop header
LB: loop body
LE: loop exit
PB: predicated region body
PF: predicated region fallthrough
CT: control target
= control target key end

     0   :  { %7 = vsyncpa [#allocation6], 0  ;;  %s2361_s0 = inlined_call_operand.hbm [shape: f32[2,4,16,128], index: 0, kind: input, shape index: {}]   ;;  %s2362_s1 = inlined_call_operand.hbm [shape: s32[2,16,128], index: 1, kind: input, shape index: {}]   ;;  %s2363_s2 = inlined_call_operand.hbm [shape: f32[1], index: 2, kind: output, shape index: {}]  }
   0x1   :  { %9 = vsyncpa [#allocation6 + $0x1], 0 }
   0x2   :  { %10 = vsyncpa [#allocation9], 0 }
   0x3   :  { %12 = vsyncpa [#allocation9 + $0x1], 0 }
   0x4   :  { %13 = vsyncpa [#allocation7], 0  ;;  %s1556_s9 = smov 0   ;;  %s1558_s10 = smov 0  }
   0x5   :  { %s1560_s11 = smov 0   ;;  %s1562_s12 = smov 0  }
   0x6 LB: > { %s1575_s13 = sadd.s32 4294967295, %s1525_s12   ;;  %s1578_s14 = sadd.s32 1, %s1525_s12   ;;  %s1525_s12 = sphi %s1562_s12, %s2381_s12   ;;  %s1521_s11 = sphi %s1560_s11, %s2380_s11   ;;  %s1517_s10 = sphi %s1558_s10, %s2379_s10   ;;  %s1513_s9 = sphi %s1556_s9, %s2378_s9  }
   0x7   : > { %s23_s15 = ssub.s32 %s1525_s12, %s1578_s14  ;;  %s26_s16 = sadd.s32 1, %s1521_s11 }
   0x8   : > { %p24_p0 = scmp.eq.s32.totalorder %s23_s15, 0  ;;  %p33_p1 = scmp.ne.s32.totalorder %s1521_s11, %s1517_s10 }
   0x9   : > { %p34_p2 = scmp.eq.s32.totalorder %s1525_s12, 0  ;;  %p39_p3 = scmp.ne.s32.totalorder %s1517_s10, %s1513_s9 }
   0xa   : > { %s1588_s17 = scalar_select %p24_p0, %s1521_s11, %s26_s16  }
   0xb   : > { %p35_p4 = por %p34_p2, %p33_p1  ;;  %p2364_p5 = scmp.eq.s32.totalorder %s1575_s13, 0 }
   0xc   : > { %p1251_p6 = scmp.lt.s32.totalorder %s1525_s12, 2  ;;  %s1599_s19 = sand.u32 1, %s1521_s11  }
   0xd   : > { %p1594_p7 = por %p2364_p5, %p39_p3  ;;  %s1170_s20 = sshll.u32 %s1599_s19, 6 }
   0xe   : > { %s1204_s21 = sshll.u32 %s1525_s12, 10  ;;  %s114_s25 = scalar_lea.vmem [#allocation5], %s1170_s20 }
   0xf   : > { %s2366_s18 = scalar_select %p1594_p7, 1, 0 }
  0x10   : > { %s1606_s24 = scalar_lea.hbm %s2361_s0, %s1204_s21  ;;  %s121_s26 = sshll.u32 %s114_s25, 4  ;;  %s1608_s26 = int_to_ptr.vmem [resolvable:$true] %s121_s26 }
  0x11   : > { %p1610_p8 = pnand %p1251_p6, %p35_p4  ;;  %s111_s28 = scalar_lea.sflag [#allocation6], %s1599_s19 }
  0x12   : > { %s1413_s29 = scalar_lea.hbm %s1606_s24, 1024  ;;  %s1418_s4 = scalar_lea.hbm %s2361_s0, 2048 }
  0x13   : > { %p1414_p10 = scmp.ne.s32.totalorder %s1606_s24, %s1413_s29  ;;  %p1415_p11 = pneg %p1610_p8 }
  0x14   : > { %p1419_p0 = scmp.lt.s32.totalorder %s1606_s24, %s2361_s0  ;;  %p1420_p1 = scmp.lt.s32.totalorder %s1418_s4, %s1413_s29 }
  0x15   : > { %p1416_p12 = pnand %p1415_p11, %p1414_p10 }
  0x16   : > { %p1421_p2 = por %p1420_p1, %p1419_p0 }
  0x17   : > { %p1417_p13 = pneg %p1416_p12 }
  0x19   : > { %p1422_p3 = pnand %p1421_p2, %p1417_p13 }
  0x1b   : > { %1425 = shalt.err (!%p1422_p3)
}
  0x1c   : > { %s1426_s7 = scalar_lea.vmem %s1608_s26, 1024  ;;  %s1531_s8 = smov [#allocation5]  }
  0x1d   : > { %p1427_p4 = scmp.ne.s32.totalorder %s1608_s26, %s1426_s7  ;;  %s1431_s9 = sshll.u32 %s1531_s8, 4  ;;  %s1432_s9 = int_to_ptr.vmem [resolvable:$false] %s1431_s9 }
  0x1e   : > { %s1433_s15 = scalar_lea.vmem %s1432_s9, 2048  ;;  %p1434_p12 = scmp.lt.s32.totalorder %s1608_s26, %s1432_s9 }
  0x1f   : > { %p1429_p6 = pnand %p1427_p4, %p1415_p11  ;;  %p1435_p5 = scmp.lt.s32.totalorder %s1433_s15, %s1426_s7 }
  0x21   : > { %p1430_p10 = pneg %p1429_p6  ;;  %p1436_p9 = por %p1435_p5, %p1434_p12 }
  0x23   : > { %p1437_p0 = pnand %p1436_p9, %p1430_p10 }
  0x25   : > { %1440 = shalt.err (!%p1437_p0)
}
  0x26   : > { %s1532_s16 = smov 128   ;;  %s1533_s20 = smov 8  }
  0x27   : > { %1247 = dma.hbm_to_vmem [thread:$0]  (!%p1610_p8), %s1606_s24, 1024, %s1608_s26, %s111_s28, %s1532_s16, %s1532_s16, %s1533_s20  }
  0x28   : > { %p150_p5 = scmp.lt.s32.totalorder %s1525_s12, 3  ;;  %s1173_s21 = sshll.u32 %s1599_s19, 4 }
  0x29   : > { %s1205_s22 = sshll.u32 %s1525_s12, 8  ;;  %p2368_p9 = scmp.ge.s32.totalorder %s1525_s12, 1 }
  0x2a   : > { %s1657_s30 = scalar_lea.hbm %s2362_s1, %s1205_s22  ;;  %s135_s3 = scalar_lea.vmem [#allocation8], %s1173_s21 }
  0x2b   : > { %p1650_p13 = pnand %p2368_p9, %p150_p5  ;;  %s142_s4 = sshll.u32 %s135_s3, 4  ;;  %s1659_s4 = int_to_ptr.vmem [resolvable:$true] %s142_s4 }
  0x2c   : > { %s132_s24 = scalar_lea.sflag [#allocation9], %s1599_s19  ;;  %s1441_s26 = scalar_lea.hbm %s1657_s30, 256 }
  0x2d   : > { %p1442_p1 = scmp.ne.s32.totalorder %s1657_s30, %s1441_s26  ;;  %s1446_s5 = scalar_lea.hbm %s2362_s1, 512 }
  0x2e   : > { %p1447_p4 = scmp.lt.s32.totalorder %s1657_s30, %s2362_s1  ;;  %p1448_p6 = scmp.lt.s32.totalorder %s1446_s5, %s1441_s26 }
  0x2f   : > { %p1444_p2 = pnand %p1442_p1, %p1415_p11 }
  0x30   : > { %p1449_p10 = por %p1448_p6, %p1447_p4 }
  0x31   : > { %p1445_p3 = pneg %p1444_p2 }
  0x33   : > { %p1450_p12 = pnand %p1449_p10, %p1445_p3 }
  0x35   : > { %1453 = shalt.err (!%p1450_p12)
}
  0x36   : > { %s1454_s19 = scalar_lea.vmem %s1659_s4, 256  ;;  %s1534_s8 = smov [#allocation8]  }
  0x37   : > { %p1455_p0 = scmp.ne.s32.totalorder %s1659_s4, %s1454_s19  ;;  %s1459_s9 = sshll.u32 %s1534_s8, 4  ;;  %s1460_s9 = int_to_ptr.vmem [resolvable:$false] %s1459_s9 }
  0x38   : > { %s1461_s15 = scalar_lea.vmem %s1460_s9, 512  ;;  %p1462_p1 = scmp.lt.s32.totalorder %s1659_s4, %s1460_s9 }
  0x39   : > { %p1457_p5 = pnand %p1455_p0, %p1415_p11  ;;  %p1463_p2 = scmp.lt.s32.totalorder %s1461_s15, %s1454_s19 }
  0x3b   : > { %p1458_p9 = pneg %p1457_p5  ;;  %p1464_p7 = por %p1463_p2, %p1462_p1 }
  0x3d   : > { %p1465_p4 = pnand %p1464_p7, %p1458_p9 }
  0x3f   : > { %1468 = shalt.err (!%p1465_p4)
}
  0x40   : > { %1250 = dma.hbm_to_vmem [thread:$0]  (!%p1610_p8), %s1657_s30, 256, %s1659_s4, %s132_s24, %s1532_s16, %s1532_s16, %s1533_s20  }
  0x41   : > { %154 = sbr.rel (%p1650_p13) target bundleno = 1376 (0x560), region = 28  ;;  %s156_s21 = sand.u32 (!%p1650_p13), 1, %s1517_s10  }
  0x42   : > { %s1177_s22 = sshll.u32 (!%p1650_p13), %s156_s21, 6  ;;  %s157_s25 = scalar_lea.sflag (!%p1650_p13), [#allocation6], %s156_s21 }
  0x43   : > { %s1690_s29 = scalar_lea.vmem (!%p1650_p13), [#allocation5], %s1177_s22  ;;  %p2370_p7 = scmp.ne.s32.totalorder (!%p1650_p13), %s2366_s18, 0 }
  0x46   : > { %1500 = dma.done.wait (%p2370_p7), %s157_s25, 1024  }
  0x47   : > { %1502 = vsyncadd (%p2370_p7), %s157_s25, 4294966272  ;;  %s1178_s27 = sshll.u32 %s156_s21, 4  ;;  %s166_s3 = scalar_lea.sflag [#allocation9], %s156_s21 }
  0x48   : > { %s169_s26 = scalar_lea.vmem [#allocation8], %s1178_s27 }
  0x49   : > { %1504 = dma.done.wait (%p2370_p7), %s166_s3, 256  }
  0x4a   : > { %1506 = vsyncadd (%p2370_p7), %s166_s3, 4294967040  ;;  %s1535_s16 = smov 0.0   ;;  %p2371_p8 = scmp.eq.s32.totalorder %s1575_s13, 0  ;;  %v1536_v0 = vmov 0.0   ;;  %v1714_v1 = vld [vmem:[%s169_s26] sm:$0xff]  ;;  %v1716_v2 = vld [vmem:[%s169_s26 + $0x8] sm:$0xff] }
  0x4b   : > { %313 = vst [vmem:[#allocation4 + $0x30] sm:$0xff] %v1536_v0  ;;  %314 = vst [vmem:[#allocation4] sm:$0xff] %v1536_v0  ;;  %v208_v3 = vld [vmem:[%s1690_s29] sm:$0xff]  ;;  %vm272_vm0 = vcmp.ne.s32.totalorder %v1714_v1, 0  ;;  %vm273_vm1 = vcmp.ne.s32.totalorder %v1716_v2, 0  ;;  %v209_v4 = vld [vmem:[%s1690_s29 + $0x8] sm:$0xff] }
  0x4c   : > { %1233 = sst [smem:[#allocation2]] (%p2371_p8), %s1535_s16  ;;  %315 = vst [vmem:[#allocation4 + $0x18] sm:$0xff] %v1536_v0  ;;  %316 = vst [vmem:[#allocation4 + $0x10] sm:$0xff] %v1536_v0  ;;  %p2372_p11 = pmov %p2371_p8  ;;  %v210_v5 = vld [vmem:[%s1690_s29 + $0x10] sm:$0xff]  ;;  %v211_v6 = vld [vmem:[%s1690_s29 + $0x18] sm:$0xff]  ;;  %v1180_v7 = vsel %vm272_vm0, 1.0, %v1536_v0 }
  0x4d   : > { %317 = vst [vmem:[#allocation4 + $0x48] sm:$0xff] %v1536_v0  ;;  %318 = vst [vmem:[#allocation4 + $0x28] sm:$0xff] %v1536_v0  ;;  %p2373_p13 = pmov %p2371_p8  ;;  %p2374_p3 = pmov %p2371_p8  ;;  %v1181_v8 = vsel %vm273_vm1, 1.0, %v1536_v0  ;;  %v212_v9 = vld [vmem:[%s1690_s29 + $0x20] sm:$0xff]  ;;  %v213_v10 = vld [vmem:[%s1690_s29 + $0x28] sm:$0xff] }
  0x4e   : > { %319 = vst [vmem:[#allocation4 + $0x8] sm:$0xff] %v1536_v0  ;;  %320 = vst [vmem:[#allocation4 + $0x20] sm:$0xff] %v1536_v0  ;;  %1234 = sst [smem:[#allocation2 + $0x1]] (%p2372_p11), %s1535_s16  ;;  %v214_v11 = vld [vmem:[%s1690_s29 + $0x30] sm:$0xff]  ;;  %v278_v12 = vadd.f32 %v1181_v8, %v1180_v7  ;;  %v215_v13 = vld [vmem:[%s1690_s29 + $0x38] sm:$0xff]  ;;  %v218_v14 = vmax.f32 %v208_v3, %v212_v9  ;;  %v221_v16 = vmax.f32 %v209_v4, %v213_v10  ;;  %s1743_s23 = smov 0  }
  0x4f   : > { %321 = vst [vmem:[#allocation4 + $0x40] sm:$0xff] %v1536_v0  ;;  %322 = vst [vmem:[#allocation4 + $0x38] sm:$0xff] %v1536_v0  ;;  %1235 = sst [smem:[#allocation2 + $0x2]] (%p2373_p13), %s1535_s16  ;;  %p2375_p6 = pmov %p2374_p3  ;;  %v219_v15 = vmax.f32 %v210_v5, %v214_v11  ;;  %v222_v17 = vmax.f32 %v211_v6, %v215_v13 }
  0x50   : > { %1236 = sst [smem:[#allocation2 + $0x3]] (%p2374_p3), %s1535_s16  ;;  %p2376_p10 = pmov %p2374_p3  ;;  %279 = vadd.xlane.f32.xlu0 %v278_v12 }
  0x51   : > { %1237 = sst [smem:[#allocation2 + $0x4]] (%p2375_p6), %s1535_s16  ;;  %p2377_p12 = pmov %p2374_p3  ;;  %v220_v18 = vmax.f32 %v218_v14, %v219_v15  ;;  %v223_v19 = vmax.f32 %v221_v16, %v222_v17 }
  0x52   : > { %1238 = sst [smem:[#allocation2 + $0x5]] (%p2376_p10), %s1535_s16 }
  0x53   : > { %1239 = sst [smem:[#allocation2 + $0x6]] (%p2377_p12), %s1535_s16  ;;  %v224_v20 = vsub.f32 %v208_v3, %v220_v18  ;;  %v226_v21 = vsub.f32 %v210_v5, %v220_v18  ;;  %v228_v22 = vsub.f32 %v212_v9, %v220_v18  ;;  %v225_v23 = vsub.f32 %v209_v4, %v223_v19 }
  0x54   : > { %v227_v24 = vsub.f32 %v211_v6, %v223_v19  ;;  %v229_v25 = vsub.f32 %v213_v10, %v223_v19  ;;  %v230_v26 = vsub.f32 %v214_v11, %v220_v18  ;;  %v231_v29 = vsub.f32 %v215_v13, %v223_v19 }
  0x55   : > { %v232_v27 = vmul.f32 1.442695, %v224_v20  ;;  %v236_v28 = vmul.f32 1.442695, %v226_v21  ;;  %v234_v30 = vmul.f32 1.442695, %v225_v23  ;;  %v302_v3 = vlaneseq }
  0x56   : > { %v238_v31 = vmul.f32 1.442695, %v227_v24  ;;  %v240_v32 = vmul.f32 1.442695, %v228_v22  ;;  %v242_v33 = vmul.f32 1.442695, %v229_v25 }
  0x57   : > { %1303 = vpow2.f32 %v232_v27  ;;  %v244_v34 = vmul.f32 1.442695, %v230_v26  ;;  %v246_v35 = vmul.f32 1.442695, %v231_v29  ;;  %v1728_v4 = vshrl.u32 %v302_v3, 7 }
  0x58   : > { %1305 = vpow2.f32 %v234_v30  ;;  %v1733_v6 = vand.u32 127, %v302_v3 }
  0x59   : > { %1307 = vpow2.f32 %v236_v28  ;;  %v1731_v5 = vadd.s32 8, %v1728_v4  ;;  %vm309_vm3 = vcmp.eq.s32.totalorder %v1728_v4, 0 }
  0x5a   : > { %1309 = vpow2.f32 %v238_v31  ;;  %vm311_vm4 = vcmp.eq.s32.totalorder %v1733_v6, 127  ;;  %vm312_vm5 = vcmp.eq.s32.totalorder %v1733_v6, 0 }
  0x5b   : > { %1311 = vpow2.f32 %v240_v32  ;;  %vm308_vm2 = vcmp.eq.s32.totalorder %v1731_v5, 15 }
  0x5c   : > { %1313 = vpow2.f32 %v242_v33 }
  0x5d   : > { %1315 = vpow2.f32 %v244_v34 }
  0x5e   : > { %1317 = vpow2.f32 %v246_v35 }
  0x64   : > { %v1304_v36 = vpop.eup %1303 }
  0x65   : > { %v1306_v37 = vpop.eup %1305 }
  0x66   : > { %v1308_v38 = vpop.eup %1307 }
  0x67   : > { %v1310_v39 = vpop.eup %1309  ;;  %v248_v40 = vadd.f32 %v1308_v38, %v1304_v36 }
  0x68   : > { %v1312_v41 = vpop.eup %1311  ;;  %v251_v42 = vadd.f32 %v1310_v39, %v1306_v37 }
  0x69   : > { %v1314_v43 = vpop.eup %1313  ;;  %v249_v44 = vadd.f32 %v1312_v41, %v248_v40 }
  0x6a   : > { %v1316_v45 = vpop.eup %1315  ;;  %v252_v46 = vadd.f32 %v1314_v43, %v251_v42 }
  0x6b   : > { %v1318_v47 = vpop.eup %1317  ;;  %v250_v48 = vadd.f32 %v1316_v45, %v249_v44 }
  0x6c   : > { %v253_v49 = vadd.f32 %v1318_v47, %v252_v46 }
  0x6d   : > { %1319 = vrcp.f32 %v250_v48 }
  0x6e   : > { %1321 = vrcp.f32 %v253_v49 }
  0x7a   : > { %v1320_v50 = vpop.eup %1319 }
  0x7b   : > { %v1322_v51 = vpop.eup %1321  ;;  %v258_v52 = vmul.f32 %v1320_v50, %v1308_v38  ;;  %v260_v53 = vmul.f32 %v1320_v50, %v1312_v41  ;;  %v262_v54 = vmul.f32 %v1320_v50, %v1316_v45  ;;  %v256_v55 = vmul.f32 %v1320_v50, %v1304_v36 }
  0x7c   : > { %v257_v56 = vmul.f32 %v1322_v51, %v1306_v37  ;;  %v259_v57 = vmul.f32 %v1322_v51, %v1310_v39  ;;  %v261_v58 = vmul.f32 %v1322_v51, %v1314_v43  ;;  %v263_v59 = vmul.f32 %v1322_v51, %v1318_v47 }
  0x7d   : > { %268 = vst [vmem:[#allocation3 + $0x20] sm:$0xff] %v260_v53  ;;  %270 = vst [vmem:[#allocation3 + $0x30] sm:$0xff] %v262_v54  ;;  %v288_v60 = vadd.f32 %v260_v53, %v258_v52 }
  0x7e   : > { %264 = vst [vmem:[#allocation3] sm:$0xff] %v256_v55  ;;  %266 = vst [vmem:[#allocation3 + $0x10] sm:$0xff] %v258_v52  ;;  %v290_v61 = vadd.f32 %v261_v58, %v259_v57 }
  0x7f   : > { %265 = vst [vmem:[#allocation3 + $0x8] sm:$0xff] %v257_v56  ;;  %267 = vst [vmem:[#allocation3 + $0x18] sm:$0xff] %v259_v57  ;;  %v289_v62 = vadd.f32 %v288_v60, %v262_v54 }
  0x80   : > { %269 = vst [vmem:[#allocation3 + $0x28] sm:$0xff] %v261_v58  ;;  %271 = vst [vmem:[#allocation3 + $0x38] sm:$0xff] %v263_v59  ;;  %v291_v63 = vadd.f32 %v290_v61, %v263_v59 }
  0x82   : > { %v292_v0 = vadd.f32 %v291_v63, %v289_v62 }
  0x84   : > { %293 = vadd.xlane.f32.xlu0 %v292_v0 }
  0xd9   : > { %v280_v7 = vpop.xlane.xlu0 %279 }
  0xda   : > { %v281_v8 = vrot.slane %v280_v7, 4 }
  0xdc   : > { %v282_v9 = vadd.f32 %v281_v8, %v280_v7 }
  0xde   : > { %v283_v10 = vrot.slane %v282_v9, 2 }
  0xe0   : > { %v284_v11 = vadd.f32 %v283_v10, %v282_v9 }
  0xe2   : > { %v285_v12 = vrot.slane %v284_v11, 1 }
  0xe4   : > { %v286_v13 = vadd.f32 %v285_v12, %v284_v11 }
  0xe6   : > { %1206 = vpush %v286_v13 }
 0x10d   : > { %v294_v14 = vpop.xlane.xlu0 %293 }
 0x10e   : > { %v295_v15 = vrot.slane %v294_v14, 4 }
 0x110   : > { %v296_v16 = vadd.f32 %v295_v15, %v294_v14 }
 0x112   : > { %v297_v17 = vrot.slane %v296_v16, 2 }
 0x114   : > { %v298_v18 = vadd.f32 %v297_v17, %v296_v16 }
 0x116   : > { %v299_v19 = vrot.slane %v298_v18, 1 }
 0x117   : > { %s1739_s18 = spop %1206 }
 0x118   : > { %v300_v20 = vadd.f32 %v299_v19, %v298_v18 }
 0x11a   : > { %1208 = vpush %v300_v20 }
 0x14b   : > { %s1741_s20 = spop %1208 }
 0x14c LB: >> { %s1182_s30 = sshll.u32 %s1529_s23, 4  ;;  %s1746_s23 = sadd.s32 1, %s1529_s23   ;;  %v1539_v24 = vmov 0.0   ;;  %v903_v27 = vld [vmem:[#allocation4 + $0x30] sm:$0xff]  ;;  %v904_v28 = vld [vmem:[#allocation4] sm:$0xff]  ;;  %vm343_vm8 = vcmp.lt.s32.totalorder %v1728_v4, 7  ;;  %s1529_s23 = sphi %s1743_s23, %s1746_s23  }
 0x14d   : >> { %v334_v21 = vstv %s1746_s23  ;;  %s1749_s4 = scalar_lea.vmem [#allocation3], %s1182_s30  ;;  %s1537_s24 = smov 1   ;;  %vm352_vm9 = vcmp.lt.s32.totalorder %v1728_v4, 1 }
 0x14e   : >> { %v1752_v22 = vld [vmem:[%s1749_s4 + $0x10] sm:$0xff]  ;;  %vm335_vm6 = vcmp.eq.s32.totalorder %v1714_v1, %v334_v21  ;;  %vm336_vm7 = vcmp.eq.s32.totalorder %v1716_v2, %v334_v21  ;;  %s1538_s12 = smov 127   ;;  %v1761_v23 = vld [vmem:[%s1749_s4 + $0x18] sm:$0xff]  ;;  %p325_p0 = scmp.ge.s32.totalorder %s1746_s23, 3  }
 0x14f   : >> { %367 = vrot.lane.b32.xlu1 %v1752_v22, %s1537_s24  ;;  %359 = vrot.lane.b32.xlu0 %v1752_v22, %s1538_s12  ;;  %v1763_v25 = vsel %vm335_vm6, 1.0, %v1539_v24  ;;  %v1765_v26 = vsel %vm336_vm7, 1.0, %v1539_v24  ;;  %v342_v34 = vrot.slane %v1761_v23, 1  ;;  %v341_v35 = vrot.slane %v1752_v22, 1  ;;  %s1187_s28 = sld [smem:[#allocation2 + $0x1]] (%p325_p0)  ;;  %p1193_p5 = scmp.ne.s32.totalorder (%p325_p0), %s1575_s13, 1 }
 0x150   : >> { %v906_v29 = vmul.f32 %v1765_v26, %v1761_v23  ;;  %v1323_v30 = vpack.i.bf16 %v1765_v26, %v1763_v25  ;;  %v905_v31 = vmul.f32 %v1763_v25, %v1752_v22  ;;  %v351_v36 = vrot.slane %v1761_v23, 7  ;;  %s1188_s5 = sld [smem:[#allocation2 + $0x2]] (%p325_p0) }
 0x151   : >> { %v350_v37 = vrot.slane %v1752_v22, 7  ;;  %v344_v38 = vsel %vm343_vm8, %v341_v35, %v342_v34  ;;  %v624_v40 = vrot.slane %v1765_v26, 1  ;;  %v623_v41 = vrot.slane %v1763_v25, 1  ;;  %s943_s19 = sld [smem:[#allocation2]] (%p325_p0) }
 0x152   : >> { %v908_v32 = vadd.f32 %v906_v29, %v904_v28  ;;  %v907_v33 = vadd.f32 %v905_v31, %v903_v27  ;;  %v348_v42 = vmin.f32 %v1752_v22, %v344_v38  ;;  %v345_v43 = vsel %vm343_vm8, %v342_v34, %v341_v35  ;;  %s1189_s8 = sld [smem:[#allocation2 + $0x3]] (%p325_p0) }
 0x153   : >> { %361 = vrot.lane.b32.xlu0 %v1761_v23, %s1538_s12  ;;  %1324 = vrot.lane.b32.xlu1 %v1323_v30, %s1538_s12  ;;  %v354_v39 = vsel %vm352_vm9, %v351_v36, %v350_v37  ;;  %v632_v45 = vrot.slane %v1765_v26, 7  ;;  %v631_v46 = vrot.slane %v1763_v25, 7  ;;  %v626_v49 = vsel %vm343_vm8, %v624_v40, %v623_v41  ;;  %s1190_s9 = sld [smem:[#allocation2 + $0x4]] (%p325_p0) }
 0x154   : >> { %910 = vst [vmem:[#allocation4] sm:$0xff] %v908_v32  ;;  %909 = vst [vmem:[#allocation4 + $0x30] sm:$0xff] %v907_v33  ;;  %v355_v44 = vsel %vm309_vm3, inf, %v354_v39  ;;  %v347_v51 = vsel %vm308_vm2, inf, %v345_v43  ;;  %v625_v54 = vsel %vm343_vm8, %v623_v41, %v624_v40  ;;  %v628_v56 = vsel %vm308_vm2, inf, %v626_v49  ;;  %s1191_s21 = sld [smem:[#allocation2 + $0x5]] (%p325_p0) }
 0x155   : >> { %v357_v52 = vmin.f32 %v348_v42, %v355_v44  ;;  %v634_v57 = vsel %vm352_vm9, %v632_v45, %v631_v46  ;;  %v349_v61 = vmin.f32 %v1761_v23, %v347_v51  ;;  %v353_v62 = vsel %vm352_vm9, %v350_v37, %v351_v36  ;;  %s960_s6 = sadd.f32 (%p325_p0), %s1739_s18, %s1187_s28 }
 0x156   : >> { %v629_v7 = vmin.f32 %v1763_v25, %v625_v54  ;;  %v630_v10 = vmin.f32 %v1765_v26, %v628_v56  ;;  %v635_v11 = vsel %vm309_vm3, inf, %v634_v57  ;;  %v633_v14 = vsel %vm352_vm9, %v631_v46, %v632_v45  ;;  %s964_s7 = sadd.f32 (%p325_p0), %s1741_s20, %s1188_s5 }
 0x157   : >> { %369 = vrot.lane.b32.xlu0 %v1761_v23, %s1537_s24  ;;  %1329 = vrot.lane.b32.xlu1 %v1323_v30, %s1537_s24  ;;  %v358_v16 = vmin.f32 %v349_v61, %v353_v62  ;;  %962 = sst [smem:[#allocation2 + $0x1]] (%p325_p0), %s960_s6 }
 0x158   : >> { %v637_v21 = vmin.f32 %v629_v7, %v635_v11  ;;  %v638_v29 = vmin.f32 %v630_v10, %v633_v14  ;;  %966 = sst [smem:[#allocation2 + $0x2]] (%p325_p0), %s964_s7 }
 0x159   : > { %s1192_s25 = sld [smem:[#allocation2 + $0x6]] (%p325_p0) }
 0x1c1   : >> { %v368_v47 = vpop.permute.xlu1 %367  ;;  %v360_v48 = vpop.permute.xlu0 %359 }
 0x1c2   : >> { %v363_v50 = vsel %vm311_vm4, inf, %v360_v48  ;;  %v371_v55 = vsel %vm312_vm5, inf, %v368_v47 }
 0x1c3   : >> { %v365_v53 = vmin.f32 %v1752_v22, %v363_v50 }
 0x1c5   : >> { %v373_v58 = vmin.f32 %v365_v53, %v371_v55  ;;  %v362_v59 = vpop.permute.xlu0 %361  ;;  %v1325_v60 = vpop.permute.xlu1 %1324 }
 0x1c6   : >> { %v364_v63 = vsel %vm311_vm4, inf, %v362_v59  ;;  %v1327_v0 = vunpack.i.h.bf16 %v1325_v60  ;;  %v1326_v3 = vunpack.i.l.bf16 %v1325_v60 }
 0x1c7   : >> { %v1819_v8 = vmin.f32 %v357_v52, %v373_v58  ;;  %v366_v9 = vmin.f32 %v1761_v23, %v364_v63 }
 0x1c8   : >> { %v644_v12 = vsel %vm311_vm4, inf, %v1327_v0  ;;  %v643_v13 = vsel %vm311_vm4, inf, %v1326_v3 }
 0x1c9   : >> { %v370_v15 = vpop.permute.xlu0 %369  ;;  %421 = vrot.lane.b32.xlu0 %v1819_v8, %s1538_s12  ;;  %v1330_v17 = vpop.permute.xlu1 %1329  ;;  %v646_v24 = vmin.f32 %v1765_v26, %v644_v12  ;;  %v645_v27 = vmin.f32 %v1763_v25, %v643_v13  ;;  %v377_v37 = vrot.slane %v1819_v8, 1  ;;  %v385_v42 = vrot.slane %v1819_v8, 7 }
 0x1ca   : >> { %v372_v18 = vsel %vm312_vm5, inf, %v370_v15  ;;  %v1332_v19 = vunpack.i.h.bf16 %v1330_v17  ;;  %v1331_v20 = vunpack.i.l.bf16 %v1330_v17 }
 0x1cb   : >> { %v374_v28 = vmin.f32 %v366_v9, %v372_v18 }
 0x1cc   : >> { %v652_v30 = vsel %vm312_vm5, inf, %v1332_v19  ;;  %v651_v31 = vsel %vm312_vm5, inf, %v1331_v20 }
 0x1cd   : >> { %v1841_v32 = vmin.f32 %v358_v16, %v374_v28  ;;  %v653_v33 = vmin.f32 %v645_v27, %v651_v31  ;;  %v654_v34 = vmin.f32 %v646_v24, %v652_v30 }
 0x1cf   : >> { %v1843_v35 = vmin.f32 %v637_v21, %v653_v33  ;;  %v1845_v36 = vmin.f32 %v638_v29, %v654_v34  ;;  %423 = vrot.lane.b32.xlu1 %v1841_v32, %s1538_s12  ;;  %v378_v38 = vrot.slane %v1841_v32, 1  ;;  %v386_v39 = vrot.slane %v1841_v32, 7 }
 0x1d1   : >> { %v1333_v40 = vpack.i.bf16 %v1845_v36, %v1843_v35  ;;  %v379_v41 = vsel %vm343_vm8, %v377_v37, %v378_v38  ;;  %v658_v43 = vrot.slane %v1845_v36, 1  ;;  %v666_v44 = vrot.slane %v1845_v36, 7 }
 0x1d2   : >> { %v657_v45 = vrot.slane %v1843_v35, 1  ;;  %v665_v46 = vrot.slane %v1843_v35, 7  ;;  %v380_v47 = vsel %vm343_vm8, %v378_v38, %v377_v37  ;;  %v388_v48 = vsel %vm352_vm9, %v386_v39, %v385_v42 }
 0x1d3   : >> { %429 = vrot.lane.b32.xlu1 %v1819_v8, %s1537_s24  ;;  %1334 = vrot.lane.b32.xlu0 %v1333_v40, %s1538_s12  ;;  %v382_v49 = vsel %vm308_vm2, -inf, %v380_v47  ;;  %v383_v50 = vmax.f32 %v1819_v8, %v379_v41  ;;  %v389_v55 = vsel %vm309_vm3, -inf, %v388_v48  ;;  %v387_v57 = vsel %vm352_vm9, %v385_v42, %v386_v39 }
 0x1d4   : >> { %v659_v51 = vsel %vm343_vm8, %v657_v45, %v658_v43  ;;  %v660_v52 = vsel %vm343_vm8, %v658_v43, %v657_v45  ;;  %v668_v53 = vsel %vm352_vm9, %v666_v44, %v665_v46  ;;  %v384_v54 = vmax.f32 %v1841_v32, %v382_v49 }
 0x1d5   : >> { %v662_v56 = vsel %vm308_vm2, -inf, %v660_v52  ;;  %v1887_v58 = vmax.f32 %v383_v50, %v389_v55  ;;  %v663_v59 = vmax.f32 %v1843_v35, %v659_v51  ;;  %v669_v62 = vsel %vm309_vm3, -inf, %v668_v53 }
 0x1d6   : >> { %v1890_v60 = vmax.f32 %v384_v54, %v387_v57  ;;  %v664_v61 = vmax.f32 %v1845_v36, %v662_v56  ;;  %v667_v63 = vsel %vm352_vm9, %v665_v46, %v666_v44  ;;  %v415_v11 = vmin.f32 %v1819_v8, %v379_v41 }
 0x1d7   : >> { %1339 = vrot.lane.b32.xlu1 %v1333_v40, %s1537_s24  ;;  %431 = vrot.lane.b32.xlu0 %v1841_v32, %s1537_s24  ;;  %v1897_v0 = vmax.f32 %v663_v59, %v669_v62  ;;  %v417_v12 = vsel %vm309_vm3, inf, %v388_v48  ;;  %v414_v13 = vsel %vm308_vm2, inf, %v380_v47  ;;  %v694_v17 = vsel %vm308_vm2, inf, %v660_v52 }
 0x1d8   : >> { %v1899_v3 = vmax.f32 %v664_v61, %v667_v63  ;;  %v419_v24 = vmin.f32 %v415_v11, %v417_v12  ;;  %v416_v28 = vmin.f32 %v1841_v32, %v414_v13  ;;  %v695_v31 = vmin.f32 %v1843_v35, %v659_v51 }
 0x1d9   : >> { %v696_v38 = vmin.f32 %v1845_v36, %v694_v17  ;;  %v697_v39 = vsel %vm309_vm3, inf, %v668_v53 }
 0x1da   : >> { %v420_v46 = vmin.f32 %v416_v28, %v387_v57  ;;  %v699_v49 = vmin.f32 %v695_v31, %v697_v39 }
 0x1db   : >> { %v700_v51 = vmin.f32 %v696_v38, %v667_v63 }
 0x23b   : >> { %v422_v7 = vpop.permute.xlu0 %421 }
 0x23c   : >> { %v425_v10 = vsel %vm311_vm4, inf, %v422_v7 }
 0x23d   : >> { %v427_v14 = vmin.f32 %v1819_v8, %v425_v10 }
 0x241   : >> { %v424_v9 = vpop.permute.xlu1 %423 }
 0x242   : >> { %v426_v18 = vsel %vm311_vm4, inf, %v424_v9 }
 0x243   : >> { %v428_v33 = vmin.f32 %v1841_v32, %v426_v18 }
 0x245   : >> { %v430_v15 = vpop.permute.xlu1 %429  ;;  %v1335_v16 = vpop.permute.xlu0 %1334 }
 0x246   : >> { %v433_v19 = vsel %vm312_vm5, inf, %v430_v15  ;;  %v1337_v20 = vunpack.i.h.bf16 %v1335_v16  ;;  %v1336_v21 = vunpack.i.l.bf16 %v1335_v16 }
 0x247   : >> { %v435_v27 = vmin.f32 %v427_v14, %v433_v19 }
 0x248   : >> { %v706_v29 = vsel %vm311_vm4, inf, %v1337_v20  ;;  %v705_v30 = vsel %vm311_vm4, inf, %v1336_v21 }
 0x249   : >> { %v1922_v34 = vmin.f32 %v419_v24, %v435_v27  ;;  %v1340_v37 = vpop.permute.xlu1 %1339  ;;  %v432_v40 = vpop.permute.xlu0 %431  ;;  %v708_v44 = vmin.f32 %v1845_v36, %v706_v29  ;;  %v707_v45 = vmin.f32 %v1843_v35, %v705_v30 }
 0x24a   : >> { %v1342_v41 = vunpack.i.h.bf16 %v1340_v37  ;;  %v1341_v42 = vunpack.i.l.bf16 %v1340_v37  ;;  %v434_v43 = vsel %vm312_vm5, inf, %v432_v40 }
 0x24b   : >> { %v436_v47 = vmin.f32 %v428_v33, %v434_v43  ;;  %491 = vrot.lane.b32.xlu0 %v1922_v34, %s1538_s12  ;;  %v439_v62 = vrot.slane %v1922_v34, 1  ;;  %v447_v10 = vrot.slane %v1922_v34, 7 }
 0x24c   : >> { %v714_v48 = vsel %vm312_vm5, inf, %v1342_v41  ;;  %v713_v50 = vsel %vm312_vm5, inf, %v1341_v42 }
 0x24d   : >> { %v715_v52 = vmin.f32 %v707_v45, %v713_v50  ;;  %v716_v53 = vmin.f32 %v708_v44, %v714_v48  ;;  %v1937_v54 = vmin.f32 %v420_v46, %v436_v47 }
 0x24f   : >> { %v1939_v55 = vmin.f32 %v699_v49, %v715_v52  ;;  %v1941_v56 = vmin.f32 %v700_v51, %v716_v53  ;;  %493 = vrot.lane.b32.xlu1 %v1937_v54, %s1538_s12  ;;  %v440_v59 = vrot.slane %v1937_v54, 1  ;;  %v448_v61 = vrot.slane %v1937_v54, 7 }
 0x251   : >> { %v1343_v57 = vpack.i.bf16 %v1941_v56, %v1939_v55  ;;  %v720_v63 = vrot.slane %v1941_v56, 1  ;;  %v719_v7 = vrot.slane %v1939_v55, 1  ;;  %v1961_v11 = vsel %vm343_vm8, %v439_v62, %v440_v59 }
 0x252   : >> { %v1965_v13 = vsel %vm352_vm9, %v448_v61, %v447_v10  ;;  %v728_v14 = vrot.slane %v1941_v56, 7  ;;  %v727_v15 = vrot.slane %v1939_v55, 7  ;;  %v442_v16 = vsel %vm343_vm8, %v440_v59, %v439_v62 }
 0x253   : >> { %499 = vrot.lane.b32.xlu1 %v1922_v34, %s1537_s24  ;;  %1344 = vrot.lane.b32.xlu0 %v1343_v57, %s1538_s12  ;;  %v1975_v18 = vsel %vm343_vm8, %v720_v63, %v719_v7  ;;  %v485_v19 = vmin.f32 %v1922_v34, %v1961_v11  ;;  %v487_v20 = vsel %vm309_vm3, inf, %v1965_v13  ;;  %v484_v21 = vsel %vm308_vm2, inf, %v442_v16 }
 0x254   : >> { %v1987_v29 = vsel %vm343_vm8, %v719_v7, %v720_v63  ;;  %v1991_v30 = vsel %vm352_vm9, %v728_v14, %v727_v15  ;;  %v764_v31 = vsel %vm308_vm2, inf, %v1975_v18  ;;  %v486_v42 = vmin.f32 %v1937_v54, %v484_v21 }
 0x255   : >> { %v489_v40 = vmin.f32 %v485_v19, %v487_v20  ;;  %v765_v45 = vmin.f32 %v1939_v55, %v1987_v29  ;;  %v766_v49 = vmin.f32 %v1941_v56, %v764_v31  ;;  %v767_v50 = vsel %vm309_vm3, inf, %v1991_v30 }
 0x257   : >> { %1349 = vrot.lane.b32.xlu1 %v1343_v57, %s1537_s24  ;;  %501 = vrot.lane.b32.xlu0 %v1937_v54, %s1537_s24  ;;  %v449_v57 = vsel %vm352_vm9, %v447_v10, %v448_v61  ;;  %v769_v19 = vmin.f32 %v765_v45, %v767_v50 }
 0x258   : >> { %v490_v7 = vmin.f32 %v486_v42, %v449_v57 }
 0x2bd   : >> { %v492_v9 = vpop.permute.xlu0 %491 }
 0x2be   : >> { %v495_v17 = vsel %vm311_vm4, inf, %v492_v9 }
 0x2bf   : >> { %v497_v24 = vmin.f32 %v1922_v34, %v495_v17  ;;  %v729_v17 = vsel %vm352_vm9, %v727_v15, %v728_v14 }
 0x2c0   : >> { %v770_v10 = vmin.f32 %v766_v49, %v729_v17 }
 0x2c1   : >> { %v494_v12 = vpop.permute.xlu1 %493 }
 0x2c2   : >> { %v496_v33 = vsel %vm311_vm4, inf, %v494_v12 }
 0x2c3   : >> { %v498_v46 = vmin.f32 %v1937_v54, %v496_v33 }
 0x2c5   : >> { %v500_v27 = vpop.permute.xlu1 %499  ;;  %v1345_v28 = vpop.permute.xlu0 %1344 }
 0x2c6   : >> { %v503_v37 = vsel %vm312_vm5, inf, %v500_v27  ;;  %v1347_v38 = vunpack.i.h.bf16 %v1345_v28  ;;  %v1346_v39 = vunpack.i.l.bf16 %v1345_v28 }
 0x2c7   : >> { %v505_v41 = vmin.f32 %v497_v24, %v503_v37 }
 0x2c8   : >> { %v776_v43 = vsel %vm311_vm4, inf, %v1347_v38  ;;  %v775_v44 = vsel %vm311_vm4, inf, %v1346_v39 }
 0x2c9   : >> { %v2008_v47 = vmin.f32 %v489_v40, %v505_v41  ;;  %v1350_v48 = vpop.permute.xlu1 %1349  ;;  %v502_v51 = vpop.permute.xlu0 %501  ;;  %v778_v62 = vmin.f32 %v1941_v56, %v776_v43  ;;  %v777_v63 = vmin.f32 %v1939_v55, %v775_v44  ;;  %v444_v44 = vsel %vm308_vm2, -inf, %v442_v16 }
 0x2ca   : >> { %v1352_v52 = vunpack.i.h.bf16 %v1350_v48  ;;  %v1351_v53 = vunpack.i.l.bf16 %v1350_v48  ;;  %v504_v59 = vsel %vm312_vm5, inf, %v502_v51  ;;  %v445_v51 = vmax.f32 %v1922_v34, %v1961_v11 }
 0x2cb   : >> { %v506_v9 = vmin.f32 %v498_v46, %v504_v59  ;;  %561 = vrot.lane.b32.xlu0 %v2008_v47, %s1538_s12  ;;  %v509_v27 = vrot.slane %v2008_v47, 1  ;;  %v517_v33 = vrot.slane %v2008_v47, 7  ;;  %v724_v16 = vsel %vm308_vm2, -inf, %v1975_v18 }
 0x2cc   : >> { %v784_v12 = vsel %vm312_vm5, inf, %v1352_v52  ;;  %v783_v61 = vsel %vm312_vm5, inf, %v1351_v53  ;;  %v446_v53 = vmax.f32 %v1937_v54, %v444_v44  ;;  %v451_v18 = vsel %vm309_vm3, -inf, %v1965_v13 }
 0x2cd   : >> { %v785_v20 = vmin.f32 %v777_v63, %v783_v61  ;;  %v786_v21 = vmin.f32 %v778_v62, %v784_v12  ;;  %v2028_v24 = vmin.f32 %v490_v7, %v506_v9  ;;  %v725_v12 = vmax.f32 %v1939_v55, %v1987_v29 }
 0x2ce   : >> { %v731_v13 = vsel %vm309_vm3, -inf, %v1991_v30 }
 0x2cf   : >> { %v2031_v28 = vmin.f32 %v769_v19, %v785_v20  ;;  %v2033_v31 = vmin.f32 %v770_v10, %v786_v21  ;;  %563 = vrot.lane.b32.xlu1 %v2028_v24, %s1538_s12  ;;  %v510_v14 = vrot.slane %v2028_v24, 1  ;;  %v518_v15 = vrot.slane %v2028_v24, 7 }
 0x2d0   : >> { %v726_v19 = vmax.f32 %v1941_v56, %v724_v16  ;;  %v2113_v30 = vmax.f32 %v725_v12, %v731_v13 }
 0x2d1   : >> { %v1353_v37 = vpack.i.bf16 %v2033_v31, %v2031_v28  ;;  %v511_v38 = vsel %vm343_vm8, %v509_v27, %v510_v14  ;;  %v520_v39 = vsel %vm352_vm9, %v518_v15, %v517_v33  ;;  %v512_v40 = vsel %vm343_vm8, %v510_v14, %v509_v27 }
 0x2d2   : >> { %v789_v41 = vrot.slane %v2031_v28, 1  ;;  %v790_v42 = vrot.slane %v2033_v31, 1  ;;  %v797_v43 = vrot.slane %v2031_v28, 7  ;;  %v798_v45 = vrot.slane %v2033_v31, 7 }
 0x2d3   : >> { %569 = vrot.lane.b32.xlu1 %v2008_v47, %s1537_s24  ;;  %1354 = vrot.lane.b32.xlu0 %v1353_v37, %s1538_s12  ;;  %v555_v46 = vmin.f32 %v2008_v47, %v511_v38  ;;  %v557_v50 = vsel %vm309_vm3, inf, %v520_v39  ;;  %v554_v52 = vsel %vm308_vm2, inf, %v512_v40  ;;  %v519_v20 = vsel %vm352_vm9, %v517_v33, %v518_v15 }
 0x2d4   : >> { %v791_v48 = vsel %vm343_vm8, %v789_v41, %v790_v42  ;;  %v792_v49 = vsel %vm343_vm8, %v790_v42, %v789_v41  ;;  %v800_v59 = vsel %vm352_vm9, %v798_v45, %v797_v43  ;;  %v799_v61 = vsel %vm352_vm9, %v797_v43, %v798_v45 }
 0x2d5   : >> { %v2077_v62 = vmin.f32 %v555_v46, %v557_v50  ;;  %v834_v11 = vsel %vm308_vm2, inf, %v792_v49  ;;  %v835_v63 = vmin.f32 %v2031_v28, %v791_v48  ;;  %v837_v9 = vsel %vm309_vm3, inf, %v800_v59 }
 0x2d6   : >> { %v836_v7 = vmin.f32 %v2033_v31, %v834_v11  ;;  %v556_v10 = vmin.f32 %v2028_v24, %v554_v52  ;;  %v2109_v14 = vmax.f32 %v446_v53, %v449_v57  ;;  %v2115_v41 = vmax.f32 %v726_v19, %v729_v17 }
 0x2d7   : >> { %1359 = vrot.lane.b32.xlu1 %v1353_v37, %s1537_s24  ;;  %571 = vrot.lane.b32.xlu0 %v2028_v24, %s1537_s24  ;;  %v2099_v21 = vmin.f32 %v835_v63, %v837_v9  ;;  %v2111_v37 = vmax.f32 %v445_v51, %v451_v18  ;;  %v1363_v33 = vpack.i.bf16 %v1899_v3, %v1897_v0  ;;  %v521_v17 = vsel %vm309_vm3, -inf, %v520_v39 }
 0x2d8   : >> { %v2101_v27 = vmin.f32 %v836_v7, %v799_v61  ;;  %v2107_v29 = vmin.f32 %v556_v10, %v519_v20  ;;  %v1368_v15 = vpack.i.bf16 %v2115_v41, %v2113_v30  ;;  %v515_v57 = vmax.f32 %v2008_v47, %v511_v38 }
 0x2d9   : >> { %v514_v42 = vsel %vm308_vm2, -inf, %v512_v40  ;;  %v794_v43 = vsel %vm308_vm2, -inf, %v792_v49  ;;  %v795_v46 = vmax.f32 %v2031_v28, %v791_v48  ;;  %v801_v39 = vsel %vm309_vm3, -inf, %v800_v59 }
 0x2da   : >> { %v2144_v44 = vmax.f32 %v515_v57, %v521_v17  ;;  %v516_v45 = vmax.f32 %v2028_v24, %v514_v42  ;;  %v796_v38 = vmax.f32 %v2033_v31, %v794_v43 }
 0x2db   : >> { %395 = vrot.lane.b32.xlu1 %v1890_v60, %s1538_s12  ;;  %393 = vrot.lane.b32.xlu0 %v1887_v58, %s1538_s12  ;;  %v2157_v49 = vmax.f32 %v795_v46, %v801_v39 }
 0x2dc   : >> { %v2155_v40 = vmax.f32 %v516_v45, %v519_v20  ;;  %v2159_v50 = vmax.f32 %v796_v38, %v799_v61 }
 0x2de   : >> { %v1388_v48 = vpack.i.bf16 %v2159_v50, %v2157_v49 }
 0x2df   : >> { %457 = vrot.lane.b32.xlu1 %v2109_v14, %s1538_s12  ;;  %455 = vrot.lane.b32.xlu0 %v2111_v37, %s1538_s12 }
 0x2e3   : >> { %1369 = vrot.lane.b32.xlu1 %v1368_v15, %s1538_s12  ;;  %1364 = vrot.lane.b32.xlu0 %v1363_v33, %s1538_s12 }
 0x2e7   : >> { %403 = vrot.lane.b32.xlu1 %v1890_v60, %s1537_s24  ;;  %401 = vrot.lane.b32.xlu0 %v1887_v58, %s1537_s24 }
 0x2eb   : >> { %465 = vrot.lane.b32.xlu1 %v2109_v14, %s1537_s24  ;;  %463 = vrot.lane.b32.xlu0 %v2111_v37, %s1537_s24 }
 0x2ef   : >> { %1379 = vrot.lane.b32.xlu1 %v1368_v15, %s1537_s24  ;;  %1374 = vrot.lane.b32.xlu0 %v1363_v33, %s1537_s24 }
 0x2f3   : >> { %533 = vrot.lane.b32.xlu1 %v2144_v44, %s1537_s24  ;;  %525 = vrot.lane.b32.xlu0 %v2144_v44, %s1538_s12 }
 0x2f7   : >> { %527 = vrot.lane.b32.xlu1 %v2155_v40, %s1538_s12  ;;  %535 = vrot.lane.b32.xlu0 %v2155_v40, %s1537_s24 }
 0x2fb   : >> { %1389 = vrot.lane.b32.xlu1 %v1388_v48, %s1537_s24  ;;  %1384 = vrot.lane.b32.xlu0 %v1388_v48, %s1538_s12 }
 0x33d   : >> { %v562_v51 = vpop.permute.xlu0 %561 }
 0x33e   : >> { %v565_v52 = vsel %vm311_vm4, inf, %v562_v51 }
 0x33f   : >> { %v567_v53 = vmin.f32 %v2008_v47, %v565_v52 }
 0x341   : >> { %v564_v16 = vpop.permute.xlu1 %563 }
 0x342   : >> { %v566_v18 = vsel %vm311_vm4, inf, %v564_v16 }
 0x343   : >> { %v568_v10 = vmin.f32 %v2028_v24, %v566_v18 }
 0x345   : >> { %v570_v59 = vpop.permute.xlu1 %569  ;;  %v1355_v11 = vpop.permute.xlu0 %1354 }
 0x346   : >> { %v573_v63 = vsel %vm312_vm5, inf, %v570_v59  ;;  %v1357_v7 = vunpack.i.h.bf16 %v1355_v11  ;;  %v1356_v9 = vunpack.i.l.bf16 %v1355_v11 }
 0x347   : >> { %v575_v12 = vmin.f32 %v567_v53, %v573_v63 }
 0x348   : >> { %v846_v19 = vsel %vm311_vm4, inf, %v1357_v7  ;;  %v845_v61 = vsel %vm311_vm4, inf, %v1356_v9 }
 0x349   : >> { %v1360_v13 = vpop.permute.xlu1 %1359  ;;  %v572_v20 = vpop.permute.xlu0 %571  ;;  %v848_v17 = vmin.f32 %v2033_v31, %v846_v19  ;;  %v847_v42 = vmin.f32 %v2031_v28, %v845_v61  ;;  %v577_v45 = vmin.f32 %v2077_v62, %v575_v12 }
 0x34a   : >> { %v1362_v15 = vunpack.i.h.bf16 %v1360_v13  ;;  %v1361_v33 = vunpack.i.l.bf16 %v1360_v13  ;;  %v574_v57 = vsel %vm312_vm5, inf, %v572_v20 }
 0x34b   : >> { %v576_v43 = vmin.f32 %v568_v10, %v574_v57  ;;  %v579_v11 = vrot.slane %v577_v45, 1  ;;  %v587_v18 = vrot.slane %v577_v45, 7 }
 0x34c   : >> { %v854_v46 = vsel %vm312_vm5, inf, %v1362_v15  ;;  %v853_v38 = vsel %vm312_vm5, inf, %v1361_v33 }
 0x34d   : >> { %v855_v39 = vmin.f32 %v847_v42, %v853_v38  ;;  %v856_v48 = vmin.f32 %v848_v17, %v854_v46  ;;  %v578_v51 = vmin.f32 %v2107_v29, %v576_v43 }
 0x34f   : >> { %v857_v16 = vmin.f32 %v2099_v21, %v855_v39  ;;  %v858_v52 = vmin.f32 %v2101_v27, %v856_v48  ;;  %v580_v53 = vrot.slane %v578_v51, 1  ;;  %v588_v59 = vrot.slane %v578_v51, 7 }
 0x351   : >> { %v859_v63 = vrot.slane %v857_v16, 1  ;;  %v860_v62 = vrot.slane %v858_v52, 1  ;;  %v867_v7 = vrot.slane %v857_v16, 7  ;;  %v868_v9 = vrot.slane %v858_v52, 7 }
 0x352   : >> { %v581_v12 = vsel %vm343_vm8, %v579_v11, %v580_v53  ;;  %v590_v19 = vsel %vm352_vm9, %v588_v59, %v587_v18  ;;  %v582_v15 = vsel %vm343_vm8, %v580_v53, %v579_v11  ;;  %v589_v33 = vsel %vm352_vm9, %v587_v18, %v588_v59 }
 0x353   : >> { %v861_v29 = vsel %vm343_vm8, %v859_v63, %v860_v62  ;;  %v862_v21 = vsel %vm343_vm8, %v860_v62, %v859_v63  ;;  %v585_v10 = vmax.f32 %v577_v45, %v581_v12  ;;  %v591_v13 = vsel %vm309_vm3, -inf, %v590_v19 }
 0x354   : >> { %v864_v27 = vsel %vm308_vm2, -inf, %v862_v21  ;;  %v865_v61 = vmax.f32 %v857_v16, %v861_v29  ;;  %v869_v57 = vsel %vm352_vm9, %v867_v7, %v868_v9  ;;  %v584_v42 = vsel %vm308_vm2, -inf, %v582_v15 }
 0x355   : >> { %v866_v20 = vmax.f32 %v858_v52, %v864_v27  ;;  %v2211_v17 = vmax.f32 %v585_v10, %v591_v13  ;;  %v870_v43 = vsel %vm352_vm9, %v868_v9, %v867_v7  ;;  %v586_v46 = vmax.f32 %v578_v51, %v584_v42  ;;  %v394_v51 = vpop.permute.xlu0 %393  ;;  %v396_v52 = vpop.permute.xlu1 %395 }
 0x356   : >> { %v871_v38 = vsel %vm309_vm3, -inf, %v870_v43  ;;  %v397_v29 = vsel %vm311_vm4, -inf, %v394_v51 }
 0x357   : >> { %v2217_v45 = vmax.f32 %v866_v20, %v869_v57  ;;  %603 = vrot.lane.b32.xlu1 %v2211_v17, %s1537_s24  ;;  %595 = vrot.lane.b32.xlu0 %v2211_v17, %s1538_s12  ;;  %v2225_v39 = vmax.f32 %v865_v61, %v871_v38  ;;  %v2227_v48 = vmax.f32 %v586_v46, %v589_v33 }
 0x358   : >> { %v399_v15 = vmax.f32 %v1887_v58, %v397_v29 }
 0x359   : >> { %v1393_v16 = vpack.i.bf16 %v2217_v45, %v2225_v39  ;;  %v456_v53 = vpop.permute.xlu0 %455  ;;  %v458_v59 = vpop.permute.xlu1 %457 }
 0x35a   : >> { %v459_v19 = vsel %vm311_vm4, -inf, %v456_v53  ;;  %v460_v46 = vsel %vm311_vm4, -inf, %v458_v59 }
 0x35b   : >> { %597 = vrot.lane.b32.xlu1 %v2227_v48, %s1538_s12  ;;  %1394 = vrot.lane.b32.xlu0 %v1393_v16, %s1538_s12  ;;  %v461_v13 = vmax.f32 %v2111_v37, %v459_v19 }
 0x35d   : >> { %v1365_v11 = vpop.permute.xlu0 %1364  ;;  %v1370_v18 = vpop.permute.xlu1 %1369 }
 0x35e   : >> { %v1372_v21 = vunpack.i.h.bf16 %v1370_v18  ;;  %v1371_v33 = vunpack.i.l.bf16 %v1370_v18  ;;  %v1367_v57 = vunpack.i.h.bf16 %v1365_v11  ;;  %v1366_v42 = vunpack.i.l.bf16 %v1365_v11 }
 0x35f   : >> { %1399 = vrot.lane.b32.xlu1 %v1393_v16, %s1537_s24  ;;  %605 = vrot.lane.b32.xlu0 %v2227_v48, %s1537_s24 }
 0x360   : >> { %v740_v38 = vsel %vm311_vm4, -inf, %v1372_v21  ;;  %v739_v11 = vsel %vm311_vm4, -inf, %v1371_v33  ;;  %v678_v18 = vsel %vm311_vm4, -inf, %v1367_v57  ;;  %v677_v59 = vsel %vm311_vm4, -inf, %v1366_v42 }
 0x361   : >> { %v402_v63 = vpop.permute.xlu0 %401  ;;  %v404_v62 = vpop.permute.xlu1 %403  ;;  %v462_v21 = vmax.f32 %v2109_v14, %v460_v46  ;;  %v741_v14 = vmax.f32 %v2113_v30, %v739_v11 }
 0x362   : >> { %v405_v20 = vsel %vm312_vm5, -inf, %v402_v63  ;;  %v398_v63 = vsel %vm311_vm4, -inf, %v396_v52 }
 0x363   : >> { %v407_v16 = vmax.f32 %v399_v15, %v405_v20  ;;  %v400_v15 = vmax.f32 %v1890_v60, %v398_v63 }
 0x365   : >> { %v464_v7 = vpop.permute.xlu0 %463  ;;  %v466_v9 = vpop.permute.xlu1 %465 }
 0x366   : >> { %v467_v27 = vsel %vm312_vm5, -inf, %v464_v7  ;;  %v468_v52 = vsel %vm312_vm5, -inf, %v466_v9  ;;  %v406_v9 = vsel %vm312_vm5, -inf, %v404_v62 }
 0x367   : >> { %v469_v43 = vmax.f32 %v461_v13, %v467_v27  ;;  %v409_v27 = vsub.f32 %v1752_v22, %v407_v16  ;;  %v679_v22 = vmax.f32 %v1897_v0, %v677_v59  ;;  %v470_v33 = vmax.f32 %v462_v21, %v468_v52 }
 0x369   : >> { %v1375_v12 = vpop.permute.xlu0 %1374  ;;  %v1380_v61 = vpop.permute.xlu1 %1379  ;;  %v471_v29 = vsub.f32 %v1819_v8, %v469_v43 }
 0x36a   : >> { %v1382_v51 = vunpack.i.h.bf16 %v1380_v61  ;;  %v1381_v53 = vunpack.i.l.bf16 %v1380_v61  ;;  %v1377_v7 = vunpack.i.h.bf16 %v1375_v12  ;;  %v1376_v37 = vunpack.i.l.bf16 %v1375_v12 }
 0x36b   : >> { %v742_v12 = vmax.f32 %v2115_v41, %v740_v38  ;;  %v680_v41 = vmax.f32 %v1899_v3, %v678_v18  ;;  %v473_v57 = vmax.f32 %v471_v29, 0.0  ;;  %v411_v3 = vmax.f32 %v409_v27, 0.0 }
 0x36c   : >> { %v748_v61 = vsel %vm312_vm5, -inf, %v1382_v51  ;;  %v747_v13 = vsel %vm312_vm5, -inf, %v1381_v53  ;;  %v686_v20 = vsel %vm312_vm5, -inf, %v1377_v7  ;;  %v685_v8 = vsel %vm312_vm5, -inf, %v1376_v37 }
 0x36d   : >> { %v526_v10 = vpop.permute.xlu0 %525  ;;  %v534_v19 = vpop.permute.xlu1 %533  ;;  %v749_v43 = vmax.f32 %v741_v14, %v747_v13  ;;  %v750_v46 = vmax.f32 %v742_v12, %v748_v61  ;;  %v687_v38 = vmax.f32 %v679_v22, %v685_v8  ;;  %v688_v16 = vmax.f32 %v680_v41, %v686_v20 }
 0x36e   : >> { %v529_v42 = vsel %vm311_vm4, -inf, %v526_v10  ;;  %v408_v53 = vmax.f32 %v400_v15, %v406_v9  ;;  %v472_v7 = vsub.f32 %v1841_v32, %v470_v33  ;;  %v475_v62 = vmul.f32 %v473_v57, %v411_v3 }
 0x36f   : >> { %v531_v0 = vmax.f32 %v2144_v44, %v529_v42  ;;  %v751_v63 = vsub.f32 %v1843_v35, %v749_v43  ;;  %v752_v11 = vsub.f32 %v1845_v36, %v750_v46  ;;  %v689_v10 = vsub.f32 %v1763_v25, %v687_v38 }
 0x370   : >> { %v690_v18 = vsub.f32 %v1765_v26, %v688_v16  ;;  %v410_v59 = vsub.f32 %v1761_v23, %v408_v53  ;;  %v537_v29 = vsel %vm312_vm5, -inf, %v534_v19  ;;  %v474_v12 = vmax.f32 %v472_v7, 0.0 }
 0x371   : >> { %v536_v58 = vpop.permute.xlu0 %535  ;;  %v528_v51 = vpop.permute.xlu1 %527  ;;  %v539_v21 = vmax.f32 %v531_v0, %v537_v29  ;;  %v477_v27 = vsub.f32 %v473_v57, %v475_v62  ;;  %v753_v52 = vmax.f32 %v751_v63, 0.0  ;;  %v754_v61 = vmax.f32 %v752_v11, 0.0 }
 0x372   : >> { %v530_v32 = vsel %vm311_vm4, -inf, %v528_v51  ;;  %v691_v13 = vmax.f32 %v689_v10, 0.0  ;;  %v692_v23 = vmax.f32 %v690_v18, 0.0  ;;  %v412_v20 = vmax.f32 %v410_v59, 0.0 }
 0x373   : >> { %v532_v19 = vmax.f32 %v2155_v40, %v530_v32  ;;  %v541_v41 = vsub.f32 %v1922_v34, %v539_v21  ;;  %v479_v33 = vmax.f32 %v477_v27, 0.0  ;;  %v538_v43 = vsel %vm312_vm5, -inf, %v536_v58 }
 0x374   : >> { %v476_v15 = vmul.f32 %v474_v12, %v412_v20  ;;  %v755_v57 = vmul.f32 %v753_v52, %v691_v13  ;;  %v756_v42 = vmul.f32 %v754_v61, %v692_v23 }
 0x375   : >> { %v1385_v30 = vpop.permute.xlu0 %1384  ;;  %v1390_v44 = vpop.permute.xlu1 %1389  ;;  %v540_v46 = vmax.f32 %v532_v19, %v538_v43  ;;  %v543_v16 = vmax.f32 %v541_v41, 0.0 }
 0x376   : >> { %v1387_v37 = vunpack.i.h.bf16 %v1385_v30  ;;  %v1386_v60 = vunpack.i.l.bf16 %v1385_v30  ;;  %v1392_v8 = vunpack.i.h.bf16 %v1390_v44  ;;  %v1391_v14 = vunpack.i.l.bf16 %v1390_v44 }
 0x377   : >> { %v481_v30 = vadd.f32 %v479_v33, %v411_v3  ;;  %v758_v53 = vsub.f32 %v754_v61, %v756_v42  ;;  %v542_v0 = vsub.f32 %v1937_v54, %v540_v46 }
 0x378   : >> { %v810_v35 = vsel %vm311_vm4, -inf, %v1387_v37  ;;  %v809_v36 = vsel %vm311_vm4, -inf, %v1386_v60  ;;  %v818_v38 = vsel %vm312_vm5, -inf, %v1392_v8  ;;  %v817_v40 = vsel %vm312_vm5, -inf, %v1391_v14 }
 0x379   : >> { %v812_v22 = vmax.f32 %v2159_v50, %v810_v35  ;;  %v811_v9 = vmax.f32 %v2157_v49, %v809_v36  ;;  %v478_v50 = vsub.f32 %v474_v12, %v476_v15  ;;  %v757_v49 = vsub.f32 %v753_v52, %v755_v57 }
 0x37a   : >> { %v545_v7 = vmul.f32 %v543_v16, %v481_v30  ;;  %v760_v63 = vmax.f32 %v758_v53, 0.0  ;;  %v544_v11 = vmax.f32 %v542_v0, 0.0 }
 0x37b   : >> { %v820_v34 = vmax.f32 %v812_v22, %v818_v38  ;;  %v819_v51 = vmax.f32 %v811_v9, %v817_v40  ;;  %v480_v37 = vmax.f32 %v478_v50, 0.0  ;;  %v759_v60 = vmax.f32 %v757_v49, 0.0 }
 0x37c   : >> { %v547_v10 = vsub.f32 %v543_v16, %v545_v7  ;;  %v762_v44 = vadd.f32 %v760_v63, %v692_v23 }
 0x37d   : >> { %v822_v62 = vsub.f32 %v1941_v56, %v820_v34  ;;  %v821_v58 = vsub.f32 %v1939_v55, %v819_v51  ;;  %v482_v21 = vadd.f32 %v480_v37, %v412_v20  ;;  %v761_v3 = vadd.f32 %v759_v60, %v691_v13  ;;  %v921_v60 = vld [vmem:[#allocation4 + $0x48] sm:$0xff] }
 0x37e   : >> { %v549_v27 = vmax.f32 %v547_v10, 0.0 }
 0x37f   : >> { %v824_v18 = vmax.f32 %v822_v62, 0.0  ;;  %v823_v59 = vmax.f32 %v821_v58, 0.0  ;;  %v546_v12 = vmul.f32 %v544_v11, %v482_v21 }
 0x381   : >> { %v825_v55 = vmul.f32 %v823_v59, %v761_v3  ;;  %v826_v35 = vmul.f32 %v824_v18, %v762_v44  ;;  %v548_v13 = vsub.f32 %v544_v11, %v546_v12 }
 0x383   : >> { %v827_v41 = vsub.f32 %v823_v59, %v825_v55  ;;  %v828_v22 = vsub.f32 %v824_v18, %v826_v35  ;;  %v550_v16 = vmax.f32 %v548_v13, 0.0 }
 0x385   : >> { %v829_v53 = vmax.f32 %v827_v41, 0.0  ;;  %v552_v11 = vadd.f32 %v550_v16, %v482_v21 }
 0x387   : >> { %v831_v59 = vadd.f32 %v829_v53, %v761_v3 }
 0x3c9   : >> { %v604_v29 = vpop.permute.xlu1 %603  ;;  %v596_v32 = vpop.permute.xlu0 %595 }
 0x3ca   : >> { %v599_v54 = vsel %vm311_vm4, -inf, %v596_v32  ;;  %v607_v36 = vsel %vm312_vm5, -inf, %v604_v29 }
 0x3cb   : >> { %v601_v56 = vmax.f32 %v2211_v17, %v599_v54  ;;  %v551_v17 = vadd.f32 %v549_v27, %v481_v30  ;;  %v912_v54 = vld [vmem:[#allocation4 + $0x18] sm:$0xff] }
 0x3cd   : >> { %v609_v52 = vmax.f32 %v601_v56, %v607_v36  ;;  %v598_v61 = vpop.permute.xlu1 %597  ;;  %v1395_v19 = vpop.permute.xlu0 %1394 }
 0x3ce   : >> { %v600_v20 = vsel %vm311_vm4, -inf, %v598_v61  ;;  %v1397_v8 = vunpack.i.h.bf16 %v1395_v19  ;;  %v1396_v14 = vunpack.i.l.bf16 %v1395_v19  ;;  %v937_v61 = vld [vmem:[#allocation4 + $0x40] sm:$0xff] }
 0x3cf   : >> { %v611_v23 = vsub.f32 %v2008_v47, %v609_v52  ;;  %v602_v15 = vmax.f32 %v2227_v48, %v600_v20  ;;  %v830_v48 = vmax.f32 %v828_v22, 0.0  ;;  %v922_v52 = vld [vmem:[#allocation4 + $0x28] sm:$0xff]  ;;  %v938_v20 = vld [vmem:[#allocation4 + $0x38] sm:$0xff] }
 0x3d0   : >> { %v880_v33 = vsel %vm311_vm4, -inf, %v1397_v8  ;;  %v879_v57 = vsel %vm311_vm4, -inf, %v1396_v14  ;;  %v928_v8 = vld [vmem:[#allocation4 + $0x8] sm:$0xff]  ;;  %v929_v14 = vld [vmem:[#allocation4 + $0x20] sm:$0xff] }
 0x3d1   : >> { %v613_v9 = vmax.f32 %v611_v23, 0.0  ;;  %v1400_v42 = vpop.permute.xlu1 %1399  ;;  %v882_v43 = vmax.f32 %v2217_v45, %v880_v33  ;;  %v881_v46 = vmax.f32 %v2225_v39, %v879_v57  ;;  %v606_v40 = vpop.permute.xlu0 %605  ;;  %v832_v63 = vadd.f32 %v830_v48, %v762_v44  ;;  %v913_v23 = vld [vmem:[#allocation4 + $0x10] sm:$0xff] }
 0x3d2   : >> { %v1402_v47 = vunpack.i.h.bf16 %v1400_v42  ;;  %v1401_v38 = vunpack.i.l.bf16 %v1400_v42  ;;  %v608_v51 = vsel %vm312_vm5, -inf, %v606_v40  ;;  %v944_v40 = vld [vmem:[#allocation4 + $0x30] sm:$0xff] (%p325_p0) }
 0x3d3   : >> { %v615_v34 = vmul.f32 %v613_v9, %v551_v17  ;;  %v610_v49 = vmax.f32 %v602_v15, %v608_v51  ;;  %v1404_v15 = vld [vmem:[%s1749_s4 + $0x18] sm:$0xff] }
 0x3d4   : >> { %v888_v50 = vsel %vm312_vm5, -inf, %v1402_v47  ;;  %v887_v30 = vsel %vm312_vm5, -inf, %v1401_v38 }
 0x3d5   : >> { %v617_v45 = vsub.f32 %v613_v9, %v615_v34  ;;  %v889_v0 = vmax.f32 %v881_v46, %v887_v30  ;;  %v890_v39 = vmax.f32 %v882_v43, %v888_v50  ;;  %v612_v7 = vsub.f32 %v2028_v24, %v610_v49  ;;  %v945_v34 = vld [vmem:[#allocation4] sm:$0xff] (%p325_p0) }
 0x3d6   : > { %v946_v50 = vadd.f32 (%p325_p0), %v945_v34, %v944_v40 }
 0x3d7   : >> { %v619_v62 = vmax.f32 %v617_v45, 0.0  ;;  %v891_v58 = vsub.f32 %v2031_v28, %v889_v0  ;;  %v892_v37 = vsub.f32 %v2033_v31, %v890_v39  ;;  %v614_v10 = vmax.f32 %v612_v7, 0.0 }
 0x3d8   : > { %947 = vadd.xlane.f32.xlu0 (%p325_p0), %v946_v50 }
 0x3d9   : >> { %v621_v18 = vadd.f32 %v619_v62, %v551_v17  ;;  %v893_v29 = vmax.f32 %v891_v58, 0.0  ;;  %v894_v32 = vmax.f32 %v892_v37, 0.0  ;;  %v616_v12 = vmul.f32 %v614_v10, %v552_v11  ;;  %v1403_v17 = vld [vmem:[%s1749_s4 + $0x10] sm:$0xff] }
 0x3db   : >> { %v914_v56 = vmul.f32 %v1763_v25, %v621_v18  ;;  %v923_v27 = vadd.f32 %v921_v60, %v621_v18  ;;  %v895_v55 = vmul.f32 %v893_v29, %v831_v59  ;;  %v896_v24 = vmul.f32 %v894_v32, %v832_v63 }
 0x3dc   : >> { %v618_v35 = vsub.f32 %v614_v10, %v616_v12 }
 0x3dd   : >> { %v916_v36 = vadd.f32 %v914_v56, %v912_v54  ;;  %925 = vst [vmem:[#allocation4 + $0x48] sm:$0xff] %v923_v27  ;;  %v897_v28 = vsub.f32 %v893_v29, %v895_v55  ;;  %v898_v31 = vsub.f32 %v894_v32, %v896_v24 }
 0x3de   : >> { %v620_v44 = vmax.f32 %v618_v35, 0.0 }
 0x3df   : >> { %918 = vst [vmem:[#allocation4 + $0x18] sm:$0xff] %v916_v36  ;;  %v899_v21 = vmax.f32 %v897_v28, 0.0  ;;  %v900_v3 = vmax.f32 %v898_v31, 0.0 }
 0x3e0   : >> { %v622_v19 = vadd.f32 %v620_v44, %v552_v11 }
 0x3e1   : >> { %v901_v13 = vadd.f32 %v899_v21, %v831_v59  ;;  %v902_v25 = vadd.f32 %v900_v3, %v832_v63 }
 0x3e2   : >> { %v915_v41 = vmul.f32 %v1765_v26, %v622_v19  ;;  %v924_v22 = vadd.f32 %v922_v52, %v622_v19 }
 0x3e3   : >> { %v930_v9 = vmul.f32 %v1403_v17, %v901_v13  ;;  %v931_v33 = vmul.f32 %v1404_v15, %v902_v25  ;;  %v939_v57 = vadd.f32 %v937_v61, %v901_v13  ;;  %v940_v42 = vadd.f32 %v938_v20, %v902_v25  ;;  %327 = sbr.rel (!%p325_p0) target bundleno = 332 (0x14c), region = 117 }
 0x3e4   : >> { %v917_v43 = vadd.f32 %v915_v41, %v913_v23  ;;  %926 = vst [vmem:[#allocation4 + $0x28] sm:$0xff] %v924_v22  ;;  %v986_v26 = vld [vmem:[#allocation4 + $0x48] sm:$0xff] (%p325_p0) }
 0x3e5   : >> { %v932_v46 = vadd.f32 %v930_v9, %v928_v8  ;;  %v933_v47 = vadd.f32 %v931_v33, %v929_v14  ;;  %941 = vst [vmem:[#allocation4 + $0x40] sm:$0xff] %v939_v57  ;;  %942 = vst [vmem:[#allocation4 + $0x38] sm:$0xff] %v940_v42 }
 0x3e6   : >> { %919 = vst [vmem:[#allocation4 + $0x10] sm:$0xff] %v917_v43  ;;  %v969_v30 = vld [vmem:[#allocation4 + $0x18] sm:$0xff] (%p325_p0) }
 0x3e7   : >> { %934 = vst [vmem:[#allocation4 + $0x8] sm:$0xff] %v932_v46  ;;  %935 = vst [vmem:[#allocation4 + $0x20] sm:$0xff] %v933_v47 }
 0x3e8   : > { %s1194_s30 = sld [smem:[#allocation2 + $0x1]] (!%p1193_p5) }
 0x3e9   : > { %s1195_s4 = sld [smem:[#allocation2 + $0x2]] (!%p1193_p5) }
 0x3eb   : > { %v987_v38 = vld [vmem:[#allocation4 + $0x28] sm:$0xff] }
 0x3ec   : > { %v988_v16 = vadd.f32 %v987_v38, %v986_v26  ;;  %v1020_v0 = vld [vmem:[#allocation4 + $0x40] sm:$0xff]  ;;  %v1021_v39 = vld [vmem:[#allocation4 + $0x38] sm:$0xff] }
 0x3ed   : > { %v970_v49 = vld [vmem:[#allocation4 + $0x10] sm:$0xff]  ;;  %v1022_v1 = vadd.f32 %v1021_v39, %v1020_v0 }
 0x3ee   : > { %v1003_v51 = vld [vmem:[#allocation4 + $0x8] sm:$0xff]  ;;  %v1004_v48 = vld [vmem:[#allocation4 + $0x20] sm:$0xff]  ;;  %989 = vadd.xlane.f32.xlu1 %v988_v16  ;;  %v971_v45 = vadd.f32 %v970_v49, %v969_v30 }
 0x3ef   : > { %v1005_v53 = vadd.f32 %v1004_v48, %v1003_v51  ;;  %s1044_s28 = sadd.f32 (!%p1193_p5), %s1195_s4, %s1194_s30 }
 0x3f0   : > { %972 = vadd.xlane.f32.xlu0 %v971_v45 }
 0x3f1   : > { %s1045_s6 = sadd.f32 (!%p1193_p5), 1.0, %s1044_s28 }
 0x3f2   : > { %1006 = vadd.xlane.f32.xlu1 %v1005_v53 }
 0x3f4   : > { %1023 = vadd.xlane.f32.xlu0 %v1022_v1 }
 0x461   : > { %v948_v5 = vpop.xlane.xlu0 %947 }
 0x462   : > { %v949_v6 = vrot.slane %v948_v5, 4 }
 0x464   : > { %v950_v62 = vadd.f32 %v949_v6, %v948_v5 }
 0x466   : > { %v951_v11 = vrot.slane %v950_v62, 2 }
 0x468   : > { %v952_v29 = vadd.f32 %v951_v11, %v950_v62 }
 0x46a   : > { %v953_v55 = vrot.slane %v952_v29, 1 }
 0x46c   : > { %v954_v36 = vadd.f32 %v953_v55, %v952_v29 }
 0x46e   : > { %1210 = vpush %v954_v36 }
 0x477   : > { %v990_v2 = vpop.xlane.xlu1 %989 }
 0x478   : > { %v991_v4 = vrot.slane %v990_v2, 4 }
 0x479   : > { %v973_v63 = vpop.xlane.xlu0 %972 }
 0x47a   : > { %v992_v7 = vadd.f32 %v991_v4, %v990_v2  ;;  %v974_v10 = vrot.slane %v973_v63, 4 }
 0x47b   : > { %v1007_v58 = vpop.xlane.xlu1 %1006 }
 0x47c   : > { %v993_v37 = vrot.slane %v992_v7, 2  ;;  %v1008_v60 = vrot.slane %v1007_v58, 4  ;;  %v975_v59 = vadd.f32 %v974_v10, %v973_v63 }
 0x47d   : > { %v1024_v54 = vpop.xlane.xlu0 %1023 }
 0x47e   : > { %v1009_v18 = vadd.f32 %v1008_v60, %v1007_v58  ;;  %v994_v12 = vadd.f32 %v993_v37, %v992_v7  ;;  %v976_v56 = vrot.slane %v975_v59, 2  ;;  %v1025_v27 = vrot.slane %v1024_v54, 4 }
 0x480   : > { %v1010_v32 = vrot.slane %v1009_v18, 2  ;;  %v1026_v35 = vadd.f32 %v1025_v27, %v1024_v54  ;;  %v977_v28 = vadd.f32 %v976_v56, %v975_v59  ;;  %v995_v31 = vrot.slane %v994_v12, 1 }
 0x482   : > { %v1011_v24 = vadd.f32 %v1010_v32, %v1009_v18  ;;  %v1027_v21 = vrot.slane %v1026_v35, 2  ;;  %v978_v3 = vrot.slane %v977_v28, 1  ;;  %v996_v19 = vadd.f32 %v995_v31, %v994_v12 }
 0x484   : > { %v1012_v44 = vrot.slane %v1011_v24, 1  ;;  %v1028_v52 = vadd.f32 %v1027_v21, %v1026_v35  ;;  %v979_v61 = vadd.f32 %v978_v3, %v977_v28 }
 0x486   : > { %v1013_v20 = vadd.f32 %v1012_v44, %v1011_v24  ;;  %1212 = vpush %v979_v61  ;;  %v1029_v13 = vrot.slane %v1028_v52, 1 }
 0x487   : > { %1214 = vpush %v996_v19 }
 0x488   : > { %1216 = vpush %v1013_v20  ;;  %v1030_v25 = vadd.f32 %v1029_v13, %v1028_v52 }
 0x48a   : > { %1218 = vpush %v1030_v25 }
 0x49f   : > { %s1211_s15 = spop %1210 }
 0x4a0   : > { %s956_s22 = sadd.f32 %s1211_s15, %s943_s19 }
 0x4a2   : > { %958 = sst [smem:[#allocation2]] %s956_s22 }
 0x4b7   : > { %s1213_s29 = spop %1212 }
 0x4b8   : > { %s981_s27 = sadd.f32 %s1213_s29, %s1189_s8  ;;  %s1215_s3 = spop %1214 }
 0x4b9   : > { %s998_s26 = sadd.f32 %s1215_s3, %s1190_s9  ;;  %s1217_s16 = spop %1216 }
 0x4ba   : > { %983 = sst [smem:[#allocation2 + $0x3]] %s981_s27 }
 0x4bb   : > { %1000 = sst [smem:[#allocation2 + $0x4]] %s998_s26  ;;  %s1219_s18 = spop %1218 }
 0x4bc   : > { %s1015_s20 = sadd.f32 %s1217_s16, %s1191_s21  ;;  %1038 = sbr.rel (%p1193_p5) target bundleno = 1370 (0x55a), region = 51 }
 0x4bd   : > { %s1032_s23 = sadd.f32 %s1219_s18, %s1192_s25 }
 0x4be   : > { %1017 = sst [smem:[#allocation2 + $0x5]] %s1015_s20 }
 0x4bf   : > { %1034 = sst [smem:[#allocation2 + $0x6]] %s1032_s23 }
 0x4c0   : > { %s1197_s24 = sld [smem:[#allocation2 + $0x4]] (!%p1193_p5) }
 0x4c1   : > { %s1199_s12 = sld [smem:[#allocation2 + $0x6]]  ;;  %v1046_v8 = vstv %s1045_s6 }
 0x4c2   : > { %s1196_s19 = sld [smem:[#allocation2 + $0x3]] }
 0x4c3   : > { %s1198_s8 = sld [smem:[#allocation2 + $0x5]] }
 0x4c4   : > { %s1039_s16 = sld [smem:[#allocation2]] }
 0x4c6   : > { %s1054_s5 = sadd.f32 1.0, %s1197_s24 }
 0x4c7   : > { %s1062_s7 = sadd.f32 1.0, %s1199_s12 }
 0x4c8   : > { %v1055_v23 = vstv %s1054_s5  ;;  %s1052_s9 = sadd.f32 1.0, %s1196_s19 }
 0x4c9   : > { %1405 = vrcp.f32 %v1055_v23  ;;  %v1063_v14 = vstv %s1062_s7  ;;  %s1060_s15 = sadd.f32 1.0, %s1198_s8 }
 0x4ca   : > { %1407 = vrcp.f32 %v1046_v8  ;;  %s1040_s18 = smul.f32 2.0, %s1039_s16 }
 0x4cb   : > { %1409 = vrcp.f32 %v1063_v14 }
 0x4cc   : > { %s1041_s20 = sadd.f32 1.0, %s1040_s18 }
 0x4d6   : > { %v1406_v41 = vpop.eup %1405 }
 0x4d7   : > { %v1408_v22 = vpop.eup %1407 }
 0x4d8   : > { %v1410_v17 = vpop.eup %1409  ;;  %1220 = vpush %v1408_v22 }
 0x4d9   : > { %1222 = vpush %v1406_v41 }
 0x4da   : > { %1224 = vpush %v1410_v17 }
 0x509   : > { %s1221_s21 = spop %1220 }
 0x50a   : > { %s1223_s22 = spop %1222  ;;  %s1049_s23 = smul.f32 %s1221_s21, %s1041_s20 }
 0x50b   : > { %s1058_s25 = smul.f32 %s1223_s22, %s1052_s9  ;;  %s1225_s29 = spop %1224 }
 0x50c   : > { %s1066_s27 = smul.f32 %s1225_s29, %s1060_s15  ;;  %s1050_s4 = ssub.f32 1.0, %s1049_s23 }
 0x50e   : > { %s1069_s3 = sadd.f32 %s1066_s27, %s1058_s25  ;;  %s1067_s26 = smul.f32 %s1066_s27, %s1058_s25 }
 0x50f   : > { %s1075_s5 = smul.f32 0.5, %s1050_s4 }
 0x510   : > { %v1070_v9 = vstv %s1069_s3  ;;  %s1068_s30 = smul.f32 2.0, %s1067_s26 }
 0x511   : > { %1411 = vrcp.f32 %v1070_v9 }
 0x51e   : > { %v1412_v15 = vpop.eup %1411 }
 0x51f   : > { %1226 = vpush %v1412_v15 }
 0x550   : > { %s1227_s24 = spop %1226 }
 0x551   : > { %s1073_s12 = smul.f32 %s1227_s24, %s1068_s30 }
 0x553   : > { %s1074_s28 = ssub.f32 1.0, %s1073_s12 }
 0x555   : > { %s1076_s6 = smul.f32 0.5, %s1074_s28 }
 0x557   : > { %s1077_s7 = sadd.f32 %s1076_s6, %s1075_s5 }
 0x559   : > { %1079 = sst [smem:[#allocation10]] %s1077_s7 }
 0x55a PF: > { %p1253_p9 = scmp.eq.s32.totalorder %s1575_s13, 1  ;;  %s1540_s19 = smov [#allocation10]  }
 0x55c   : > { %1241 = dma.smem_to_hbm (%p1253_p9), %s1540_s19, 16, %s2363_s2, [#allocation7]  }
 0x55d   : > { %1508 = dma.done.wait (%p1253_p9), [#allocation7], 16  }
 0x55e   : > { %1510 = vsyncadd (%p1253_p9), [#allocation7], 4294967280 }
 0x55f   : > { %1093 = sfence }
 0x560 PF: > { %p16_p1 = scmp.ge.s32.totalorder %s1578_s14, 4   ;;  %s2378_s9 = smov %s1517_s10 }
 0x561   : > { %s2379_s10 = smov %s1521_s11  ;;  %s2380_s11 = smov %s1588_s17 }
 0x562   : > { %s2381_s12 = smov %s1578_s14  ;;  %18 = sbr.rel (!%p16_p1) target bundleno = 6 (0x6), region = 128 }
 0x567   :  { %1099 = vsyncpa [#allocation6], 1 }
 0x568   :  { %1101 = vsyncpa [#allocation6 + $0x1], 1 }
 0x569   :  { %1102 = vsyncpa [#allocation9], 1 }
 0x56a   :  { %1104 = vsyncpa [#allocation9 + $0x1], 1 }
 0x56b   :  { %1105 = vsyncpa [#allocation7], 1 }
 0x56c   :  { %1107 = vsyncpa [#allocation7 + $0x1], 1 }

</bundles_post_ra>
